<compile_context>
chip_gen: v5e
topology: v5e:2x2
jax: 0.10.0
libtpu: 0.0.40
codegen_flags: <defaults>
</compile_context>

<pallas_src>
import functools

import jax
import jax.numpy as jnp
from jax.experimental import pallas as pl
from jax.experimental.pallas import tpu as pltpu


# Flat 48 MiB: leaves headroom on v7x (64 MiB physical per TensorCore) and is
# far above the per-kernel working sets (<10 MiB) used by these tile sizes.
_VMEM_LIMIT = 48 * 1024 * 1024


# ----------------------------------------------------------------------------
# Tiling helper
# ----------------------------------------------------------------------------
def _pick_tile(dim, target, multiple, prefer=None):
    """Largest tile <= target that evenly divides `dim`.  Prefers multiples of
    `prefer` (256 for MXU-friendly N/K tiles on v6e/v7x), falls back to
    multiples of `multiple`, finally the full dim (always legal)."""
    if dim <= target:
        return dim
    if prefer is not None and prefer > multiple:
        t = (target // prefer) * prefer
        while t >= prefer:
            if dim % t == 0:
                return t
            t -= prefer
    t = (target // multiple) * multiple
    while t >= multiple:
        if dim % t == 0:
            return t
        t -= multiple
    return dim


# ----------------------------------------------------------------------------
# Pallas kernels
# ----------------------------------------------------------------------------
def _layernorm_kernel(x_ref, g_ref, b_ref, o_ref, *, eps):
    x = x_ref[...].astype(jnp.float32)
    mu = jnp.mean(x, axis=-1, keepdims=True)
    var = jnp.mean((x - mu) ** 2, axis=-1, keepdims=True)
    y = (x - mu) * jax.lax.rsqrt(var + eps) * g_ref[...] + b_ref[...]
    o_ref[...] = y.astype(o_ref.dtype)


def _qkv_split_kernel(x_ref, w_ref, b_ref, o_ref, acc_ref, *, num_heads):
    """Q/K/V projection with the head split fused into the output layout.
    Grid = (3, B, S_tiles, K_tiles); K is the reduction axis.
    Refs: x (1,ts,tk) bf16, w (nH,tk,Dh) bf16, b (nH,1,Dh) f32,
          o (nH,1,ts,Dh) bf16, acc (nH,ts,Dh) f32."""
    ki = pl.program_id(3)

    @pl.when(ki == 0)
    def _():
        acc_ref[...] = jnp.zeros_like(acc_ref)

    x = x_ref[0]                                  # (ts, tk) bf16
    for h in range(num_heads):                    # static unroll -> nH MXU ops
        acc_ref[h] += jnp.dot(x, w_ref[h], preferred_element_type=jnp.float32)

    @pl.when(ki == pl.num_programs(3) - 1)
    def _():
        for h in range(num_heads):
            o_ref[h, 0] = (acc_ref[h] + b_ref[h]).astype(o_ref.dtype)


def _flash_attn_kernel(q_ref, k_ref, v_ref, m_ref, o_ref,
                       m_sc, l_sc, acc_sc, *, sm_scale):
    """Flash-style online-softmax attention over the packed [3*nH,B,S,Dh]
    QKV tensor.  Grid = (nH, B, q_tiles, kv_tiles); kv is the reduction axis.
    Refs: q (1,1,tq,Dh), k/v (1,1,tk,Dh) bf16, mask (1,1,tk) f32."""
    ki = pl.program_id(3)

    @pl.when(ki == 0)
    def _():
        m_sc[...] = jnp.full(m_sc.shape, -jnp.inf, dtype=m_sc.dtype)
        l_sc[...] = jnp.zeros_like(l_sc)
        acc_sc[...] = jnp.zeros_like(acc_sc)

    q = q_ref[0]                                  # (1, tq, Dh) bf16
    k = k_ref[0]                                  # (1, tk, Dh) bf16
    s = jnp.einsum("bqd,bkd->bqk", q, k,
                   preferred_element_type=jnp.float32) * sm_scale
    s = s + m_ref[...]                            # additive key mask [1,1,tk]

    m_new = jnp.maximum(m_sc[...], jnp.max(s, axis=-1, keepdims=True))
    alpha = jnp.exp(m_sc[...] - m_new)
    p = jnp.exp(s - m_new)
    l_sc[...] = alpha * l_sc[...] + jnp.sum(p, axis=-1, keepdims=True)
    acc_sc[...] = alpha * acc_sc[...] + jnp.einsum(
        "bqk,bkd->bqd", p.astype(jnp.bfloat16), v_ref[0],
        preferred_element_type=jnp.float32)
    m_sc[...] = m_new

    @pl.when(ki == pl.num_programs(3) - 1)
    def _():
        o_ref[0] = (acc_sc[...] *
                    pl.reciprocal(l_sc[...], approx=True)).astype(o_ref.dtype)


def _oproj_res_ln_kernel(a_ref, w_ref, b_ref, r_ref, g_ref, beta_ref,
                         o_ref, acc_ref, *, eps):
    """Attention output projection with the head merge fused into the LHS
    in_spec (heads walked on the reduction grid axis), plus fused bias +
    residual + LayerNorm epilogue.  Grid = (B, S_tiles, nH)."""
    hi = pl.program_id(2)

    @pl.when(hi == 0)
    def _():
        acc_ref[...] = jnp.zeros_like(acc_ref)

    acc_ref[...] += jnp.dot(a_ref[0, 0], w_ref[0],
                            preferred_element_type=jnp.float32)

    @pl.when(hi == pl.num_programs(2) - 1)
    def _():
        y = acc_ref[...] + b_ref[...] + r_ref[0].astype(jnp.float32)
        mu = jnp.mean(y, axis=-1, keepdims=True)
        var = jnp.mean((y - mu) ** 2, axis=-1, keepdims=True)
        o_ref[0] = ((y - mu) * jax.lax.rsqrt(var + eps) * g_ref[...]
                    + beta_ref[...]).astype(o_ref.dtype)


def _mm_bias_kernel(x_ref, w_ref, b_ref, o_ref, acc_ref, *, activation):
    """Tiled matmul: o = act(x @ w + b). Grid = (Mt, Nt, Kt)."""
    @pl.when(pl.program_id(2) == 0)
    def _():
        acc_ref[...] = jnp.zeros_like(acc_ref)

    acc_ref[...] += jnp.dot(x_ref[...], w_ref[...],
                            preferred_element_type=jnp.float32)

    @pl.when(pl.program_id(2) == pl.num_programs(2) - 1)
    def _():
        y = acc_ref[...] + b_ref[...]
        if activation == "gelu":
            y = jax.nn.gelu(y)  # tanh approx; see TODO(synk) above
        o_ref[...] = y.astype(o_ref.dtype)


def _mm_res_ln_kernel(x_ref, w_ref, b_ref, r_ref, g_ref, beta_ref,
                      o_ref, acc_ref, *, eps):
    """Tiled matmul with fused epilogue: o = LayerNorm(x @ w + b + residual).
    Requires full-N blocks (row-wise LayerNorm). Grid = (Mt, Kt)."""
    @pl.when(pl.program_id(1) == 0)
    def _():
        acc_ref[...] = jnp.zeros_like(acc_ref)

    acc_ref[...] += jnp.dot(x_ref[...], w_ref[...],
                            preferred_element_type=jnp.float32)

    @pl.when(pl.program_id(1) == pl.num_programs(1) - 1)
    def _():
        y = acc_ref[...] + b_ref[...] + r_ref[...].astype(jnp.float32)
        mu = jnp.mean(y, axis=-1, keepdims=True)
        var = jnp.mean((y - mu) ** 2, axis=-1, keepdims=True)
        o_ref[...] = ((y - mu) * jax.lax.rsqrt(var + eps) * g_ref[...]
                      + beta_ref[...]).astype(o_ref.dtype)


def _heads_kernel(x_ref, w_ref, b_ref, o_ref):
    """Fused 3-way classifier: one lane-dense (128-padded) matmul."""
    o_ref[...] = jnp.dot(x_ref[...], w_ref[...],
                         preferred_element_type=jnp.float32) + b_ref[...]


# ----------------------------------------------------------------------------
# pallas_call wrappers
# ----------------------------------------------------------------------------
def layernorm(x, gamma, beta, eps=1e-7, tm_target=1024):
    M, H = x.shape
    tm = _pick_tile(M, tm_target, 8)
    return pl.pallas_call(
        functools.partial(_layernorm_kernel, eps=eps),
        out_shape=jax.ShapeDtypeStruct((M, H), jnp.bfloat16),
        grid_spec=pltpu.PrefetchScalarGridSpec(
            num_scalar_prefetch=0, grid=(M // tm,),
            in_specs=[
                pl.BlockSpec((tm, H), lambda i: (i, 0)),
                pl.BlockSpec((1, H), lambda i: (0, 0)),
                pl.BlockSpec((1, H), lambda i: (0, 0)),
            ],
            out_specs=pl.BlockSpec((tm, H), lambda i: (i, 0)),
        ),
        compiler_params=pltpu.CompilerParams(
            dimension_semantics=("parallel",), vmem_limit_bytes=_VMEM_LIMIT),
    )(x, gamma, beta)


def qkv_project(x3d, w_qkv, b_qkv, ts_target=512, tk_target=512):
    """x3d [B,S,H] bf16, w_qkv [3*nH,H,Dh] bf16, b_qkv [3*nH,1,Dh] f32
    -> [3*nH, B, S, Dh] bf16 (head-split layout, no XLA transposes)."""
    B, S, H = x3d.shape
    n3, _, Dh = w_qkv.shape
    nH = n3 // 3
    ts = _pick_tile(S, ts_target, 8)
    tk = _pick_tile(H, tk_target, 128, prefer=256)
    grid = (3, B, S // ts, H // tk)
    kern = functools.partial(_qkv_split_kernel, num_heads=nH)
    return pl.pallas_call(
        kern,
        out_shape=jax.ShapeDtypeStruct((3 * nH, B, S, Dh), jnp.bfloat16),
        grid_spec=pltpu.PrefetchScalarGridSpec(
            num_scalar_prefetch=0, grid=grid,
            in_specs=[
                pl.BlockSpec((1, ts, tk), lambda p, b, si, ki: (b, si, ki)),
                pl.BlockSpec((nH, tk, Dh), lambda p, b, si, ki: (p, ki, 0)),
                pl.BlockSpec((nH, 1, Dh), lambda p, b, si, ki: (p, 0, 0)),
            ],
            out_specs=pl.BlockSpec((nH, 1, ts, Dh),
                                   lambda p, b, si, ki: (p, b, si, 0)),
            scratch_shapes=[pltpu.VMEM((nH, ts, Dh), jnp.float32)],
        ),
        compiler_params=pltpu.CompilerParams(
            dimension_semantics=("parallel", "parallel", "parallel", "arbitrary"),
            vmem_limit_bytes=_VMEM_LIMIT),
    )(x3d, w_qkv, b_qkv)


def flash_attention(qkv, mask_add, tq_target=512, tk_target=512):
    """qkv [3*nH,B,S,Dh] bf16, mask_add [B,1,S] f32 -> [nH,B,S,Dh] bf16."""
    n3, B, S, Dh = qkv.shape
    nH = n3 // 3
    tq = _pick_tile(S, tq_target, 8)
    tk = _pick_tile(S, tk_target, 128)
    grid = (nH, B, S // tq, S // tk)
    sm_scale = 1.0 / float(Dh) ** 0.5
    kern = functools.partial(_flash_attn_kernel, sm_scale=sm_scale)
    return pl.pallas_call(
        kern,
        out_shape=jax.ShapeDtypeStruct((nH, B, S, Dh), jnp.bfloat16),
        grid_spec=pltpu.PrefetchScalarGridSpec(
            num_scalar_prefetch=0, grid=grid,
            in_specs=[
                pl.BlockSpec((1, 1, tq, Dh),
                             lambda h, b, qi, ki: (h, b, qi, 0)),
                pl.BlockSpec((1, 1, tk, Dh),
                             lambda h, b, qi, ki: (nH + h, b, ki, 0)),
                pl.BlockSpec((1, 1, tk, Dh),
                             lambda h, b, qi, ki: (2 * nH + h, b, ki, 0)),
                pl.BlockSpec((1, 1, tk), lambda h, b, qi, ki: (b, 0, ki)),
            ],
            out_specs=pl.BlockSpec((1, 1, tq, Dh),
                                   lambda h, b, qi, ki: (h, b, qi, 0)),
            scratch_shapes=[
                pltpu.VMEM((1, tq, 1), jnp.float32),
                pltpu.VMEM((1, tq, 1), jnp.float32),
                pltpu.VMEM((1, tq, Dh), jnp.float32),
            ],
        ),
        compiler_params=pltpu.CompilerParams(
            dimension_semantics=("parallel", "parallel", "parallel", "arbitrary"),
            vmem_limit_bytes=_VMEM_LIMIT),
    )(qkv, qkv, qkv, mask_add)


def oproj_residual_layernorm(attn, o_w, o_b, residual, gamma, beta,
                             eps=1e-7, ts_target=512):
    """attn [nH,B,S,Dh] bf16, o_w [nH,Dh,H] bf16, residual [B,S,H] bf16
    -> LayerNorm(merge_heads(attn) @ o_w + o_b + residual)  [B,S,H] bf16."""
    nH, B, S, Dh = attn.shape
    H = o_w.shape[-1]
    ts = _pick_tile(S, ts_target, 8)
    grid = (B, S // ts, nH)
    kern = functools.partial(_oproj_res_ln_kernel, eps=eps)
    return pl.pallas_call(
        kern,
        out_shape=jax.ShapeDtypeStruct((B, S, H), jnp.bfloat16),
        grid_spec=pltpu.PrefetchScalarGridSpec(
            num_scalar_prefetch=0, grid=grid,
            in_specs=[
                pl.BlockSpec((1, 1, ts, Dh), lambda b, si, h: (h, b, si, 0)),
                pl.BlockSpec((1, Dh, H), lambda b, si, h: (h, 0, 0)),
                pl.BlockSpec((1, H), lambda b, si, h: (0, 0)),
                pl.BlockSpec((1, ts, H), lambda b, si, h: (b, si, 0)),
                pl.BlockSpec((1, H), lambda b, si, h: (0, 0)),
                pl.BlockSpec((1, H), lambda b, si, h: (0, 0)),
            ],
            out_specs=pl.BlockSpec((1, ts, H), lambda b, si, h: (b, si, 0)),
            scratch_shapes=[pltpu.VMEM((ts, H), jnp.float32)],
        ),
        compiler_params=pltpu.CompilerParams(
            dimension_semantics=("parallel", "parallel", "arbitrary"),
            vmem_limit_bytes=_VMEM_LIMIT),
    )(attn, o_w, o_b, residual, gamma, beta)


def matmul_bias(x, w, b, activation=None,
                tm_target=512, tn_target=1024, tk_target=512):
    M, K = x.shape
    N = w.shape[1]
    tm = _pick_tile(M, tm_target, 8)
    tn = _pick_tile(N, tn_target, 128, prefer=256)
    tk = _pick_tile(K, tk_target, 128, prefer=256)
    grid = (M // tm, N // tn, K // tk)
    kern = functools.partial(_mm_bias_kernel, activation=activation)
    return pl.pallas_call(
        kern,
        out_shape=jax.ShapeDtypeStruct((M, N), jnp.bfloat16),
        grid_spec=pltpu.PrefetchScalarGridSpec(
            num_scalar_prefetch=0, grid=grid,
            in_specs=[
                pl.BlockSpec((tm, tk), lambda i, j, k: (i, k)),
                pl.BlockSpec((tk, tn), lambda i, j, k: (k, j)),
                pl.BlockSpec((1, tn), lambda i, j, k: (0, j)),
            ],
            out_specs=pl.BlockSpec((tm, tn), lambda i, j, k: (i, j)),
            scratch_shapes=[pltpu.VMEM((tm, tn), jnp.float32)],
        ),
        compiler_params=pltpu.CompilerParams(
            dimension_semantics=("parallel", "parallel", "arbitrary"),
            vmem_limit_bytes=_VMEM_LIMIT),
        cost_estimate=pl.CostEstimate(
            flops=2 * M * N * K,
            transcendentals=M * N if activation == "gelu" else 0,
            bytes_accessed=2 * M * K + 2 * K * N + 2 * M * N),
    )(x, w, b)


def matmul_residual_layernorm(x, w, b, residual, gamma, beta, eps=1e-7,
                              tm_target=512, tk_target=512):
    M, K = x.shape
    N = w.shape[1]
    tm = _pick_tile(M, tm_target, 8)
    tk = _pick_tile(K, tk_target, 128, prefer=256)
    grid = (M // tm, K // tk)
    kern = functools.partial(_mm_res_ln_kernel, eps=eps)
    return pl.pallas_call(
        kern,
        out_shape=jax.ShapeDtypeStruct((M, N), jnp.bfloat16),
        grid_spec=pltpu.PrefetchScalarGridSpec(
            num_scalar_prefetch=0, grid=grid,
            in_specs=[
                pl.BlockSpec((tm, tk), lambda i, k: (i, k)),
                pl.BlockSpec((tk, N), lambda i, k: (k, 0)),
                pl.BlockSpec((1, N), lambda i, k: (0, 0)),
                pl.BlockSpec((tm, N), lambda i, k: (i, 0)),
                pl.BlockSpec((1, N), lambda i, k: (0, 0)),
                pl.BlockSpec((1, N), lambda i, k: (0, 0)),
            ],
            out_specs=pl.BlockSpec((tm, N), lambda i, k: (i, 0)),
            scratch_shapes=[pltpu.VMEM((tm, N), jnp.float32)],
        ),
        compiler_params=pltpu.CompilerParams(
            dimension_semantics=("parallel", "arbitrary"),
            vmem_limit_bytes=_VMEM_LIMIT),
        cost_estimate=pl.CostEstimate(
            flops=2 * M * N * K,
            transcendentals=M,
            bytes_accessed=2 * M * K + 2 * K * N + 4 * M * N),
    )(x, w, b, residual, gamma, beta)


def fused_heads(pooled, w_heads, b_heads):
    B, H = pooled.shape
    Npad = w_heads.shape[1]
    tb = _pick_tile(B, 512, 8)
    return pl.pallas_call(
        _heads_kernel,
        out_shape=jax.ShapeDtypeStruct((B, Npad), jnp.float32),
        grid_spec=pltpu.PrefetchScalarGridSpec(
            num_scalar_prefetch=0, grid=(B // tb,),
            in_specs=[
                pl.BlockSpec((tb, H), lambda i: (i, 0)),
                pl.BlockSpec((H, Npad), lambda i: (0, 0)),
                pl.BlockSpec((1, Npad), lambda i: (0, 0)),
            ],
            out_specs=pl.BlockSpec((tb, Npad), lambda i: (i, 0)),
        ),
        compiler_params=pltpu.CompilerParams(
            dimension_semantics=("parallel",), vmem_limit_bytes=_VMEM_LIMIT),
    )(pooled, w_heads, b_heads)


# ----------------------------------------------------------------------------
# Model: parameters + forward
# ----------------------------------------------------------------------------
def init_params(key, *, vocab, hidden, num_heads, intermediate, num_layers,
                num_categories, num_subcategories, num_assignment_groups):
    keys = iter(jax.random.split(key, 16 + 16 * num_layers))

    def nrm(shape, scale=0.02):
        return scale * jax.random.normal(next(keys), shape, jnp.float32)

    H = hidden
    nH = num_heads
    Dh = H // nH
    n1, n2, n3 = num_categories, num_subcategories, num_assignment_groups
    ntot = n1 + n2 + n3
    npad = ((ntot + 127) // 128) * 128              # lane-dense padded head width

    heads_w = jnp.concatenate([nrm((H, n1)), nrm((H, n2)), nrm((H, n3))], axis=1)
    heads_w = jnp.pad(heads_w, ((0, 0), (0, npad - ntot)))

    params = {
        "hidden": H,
        "num_heads": nH,
        "head_sizes": (n1, n2, n3),
        "word_emb": nrm((vocab, H)).astype(jnp.bfloat16),
        "emb_ln_g": jnp.ones((1, H), jnp.float32),
        "emb_ln_b": jnp.zeros((1, H), jnp.float32),
        "heads_w": heads_w.astype(jnp.bfloat16),
        "heads_b": jnp.zeros((1, npad), jnp.float32),
        "layers": [],
    }
    for _ in range(num_layers):
        # Q/K/V weights stored head-split: [3*nH, H, Dh]
        wq, wk, wv = nrm((H, H)), nrm((H, H)), nrm((H, H))
        qkv_w = jnp.stack([wq, wk, wv], axis=0)               # [3, H, H]
        qkv_w = qkv_w.reshape(3, H, nH, Dh).transpose(0, 2, 1, 3)
        qkv_w = qkv_w.reshape(3 * nH, H, Dh)
        # o-proj stored head-split on its contraction axis: [nH, Dh, H]
        o_w = nrm((H, H)).reshape(nH, Dh, H)
        params["layers"].append({
            "qkv_w": qkv_w.astype(jnp.bfloat16),
            "qkv_b": jnp.zeros((3 * nH, 1, Dh), jnp.float32),
            "o_w": o_w.astype(jnp.bfloat16),
            "o_b": jnp.zeros((1, H), jnp.float32),
            "ln1_g": jnp.ones((1, H), jnp.float32),
            "ln1_b": jnp.zeros((1, H), jnp.float32),
            "f1_w": nrm((H, intermediate)).astype(jnp.bfloat16),
            "f1_b": jnp.zeros((1, intermediate), jnp.float32),
            "f2_w": nrm((intermediate, H)).astype(jnp.bfloat16),
            "f2_b": jnp.zeros((1, H), jnp.float32),
            "ln2_g": jnp.ones((1, H), jnp.float32),
            "ln2_b": jnp.zeros((1, H), jnp.float32),
        })
    return params


def deberta_multitask_forward(params, input_ids, attention_mask):
    B, S = input_ids.shape
    H = params["hidden"]

    # --- embeddings (gather is XLA glue; LayerNorm is a Pallas kernel) ---
    emb = params["word_emb"][input_ids].reshape(B * S, H)        # [B*S, H] bf16
    h = layernorm(emb, params["emb_ln_g"], params["emb_ln_b"])   # [B*S, H] bf16

    # additive key-position mask, [B, 1, S]; broadcast per head/query in-kernel
    mask_add = (1.0 - attention_mask.astype(jnp.float32))[:, None, :] * -1e9

    for layer in params["layers"]:
        x3d = h.reshape(B, S, H)                                  # free reshape
        # Q/K/V projection, head-split output [3*nH, B, S, Dh]
        qkv = qkv_project(x3d, layer["qkv_w"], layer["qkv_b"])
        # flash attention directly on the head-split layout -> [nH, B, S, Dh]
        attn = flash_attention(qkv, mask_add)
        # o-proj (heads merged on the reduction axis) + residual + LayerNorm1
        h3d = oproj_residual_layernorm(attn, layer["o_w"], layer["o_b"],
                                       x3d, layer["ln1_g"], layer["ln1_b"])
        hm = h3d.reshape(B * S, H)                                # free reshape
        # FFN up-proj + GELU, fused
        ffn = matmul_bias(hm, layer["f1_w"], layer["f1_b"], activation="gelu")
        # FFN down-proj + residual + LayerNorm2, fused
        h = matmul_residual_layernorm(ffn, layer["f2_w"], layer["f2_b"],
                                      hm, layer["ln2_g"], layer["ln2_b"])

    # --- CLS pooling + fused three-head classifier (one lane-dense matmul) ---
    pooled = h.reshape(B, S, H)[:, 0, :]                          # [B, H] bf16
    logits = fused_heads(pooled, params["heads_w"], params["heads_b"])
    n1, n2, n3 = params["head_sizes"]
    return (logits[:, :n1],
            logits[:, n1:n1 + n2],
            logits[:, n1 + n2:n1 + n2 + n3])


# ----------------------------------------------------------------------------
# Main
# ----------------------------------------------------------------------------
if __name__ == "__main__":
    B, S = 2, 8
    HIDDEN, NUM_HEADS, INTERMEDIATE, NUM_LAYERS = 32, 4, 64, 2
    VOCAB = 64
    NUM_CATEGORIES, NUM_SUBCATEGORIES, NUM_ASSIGNMENT_GROUPS = 5, 7, 6

    root = jax.random.PRNGKey(0)
    k_params, k_ids = jax.random.split(root)

    params = init_params(
        k_params,
        vocab=VOCAB, hidden=HIDDEN, num_heads=NUM_HEADS,
        intermediate=INTERMEDIATE, num_layers=NUM_LAYERS,
        num_categories=NUM_CATEGORIES,
        num_subcategories=NUM_SUBCATEGORIES,
        num_assignment_groups=NUM_ASSIGNMENT_GROUPS,
    )

    input_ids = jax.random.randint(k_ids, (B, S), 0, VOCAB, dtype=jnp.int32)
    attention_mask = jnp.array(
        [[1, 1, 1, 1, 1, 1, 1, 1],
         [1, 1, 1, 1, 1, 0, 0, 0]], dtype=jnp.int32)

    fwd = jax.jit(functools.partial(deberta_multitask_forward, params))
    cat_logits, subcat_logits, assign_logits = fwd(input_ids, attention_mask)
    jax.block_until_ready((cat_logits, subcat_logits, assign_logits))

    assert cat_logits.shape == (B, NUM_CATEGORIES)
    assert subcat_logits.shape == (B, NUM_SUBCATEGORIES)
    assert assign_logits.shape == (B, NUM_ASSIGNMENT_GROUPS)
    assert bool(jnp.all(jnp.isfinite(cat_logits)))
    assert bool(jnp.all(jnp.isfinite(subcat_logits)))
    assert bool(jnp.all(jnp.isfinite(assign_logits)))
    print("KERNEL_OK")
</pallas_src>

<mosaic_0001>
module attributes {stable_mosaic.version = 11 : i64} {
  func.func @_flash_attn_kernel(%arg0: i32, %arg1: i32, %arg2: i32, %arg3: i32, %arg4: memref<1x1x8x8xbf16, #tpu.memory_space<vmem>>, %arg5: memref<1x1x8x8xbf16, #tpu.memory_space<vmem>>, %arg6: memref<1x1x8x8xbf16, #tpu.memory_space<vmem>>, %arg7: memref<1x1x8xf32, #tpu.memory_space<vmem>>, %arg8: memref<1x1x8x8xbf16, #tpu.memory_space<vmem>>, %arg9: memref<1x8x1xf32, #tpu.memory_space<vmem>>, %arg10: memref<1x8x1xf32, #tpu.memory_space<vmem>>, %arg11: memref<1x8x8xf32, #tpu.memory_space<vmem>>) attributes {dimension_semantics = [#tpu.dimension_semantics<parallel>, #tpu.dimension_semantics<parallel>, #tpu.dimension_semantics<parallel>, #tpu.dimension_semantics<arbitrary>], iteration_bounds = array<i64: 4, 2, 1, 1>, scalar_prefetch = 0 : i64, scratch_operands = 3 : i64, tpu.core_type = #tpu.core_type<tc>, window_params = [{transform_indices = @transform_0, window_bounds = array<i64: 1, 1, 8, 8>}, {transform_indices = @transform_1, window_bounds = array<i64: 1, 1, 8, 8>}, {transform_indices = @transform_2, window_bounds = array<i64: 1, 1, 8, 8>}, {transform_indices = @transform_3, window_bounds = array<i64: 1, 1, 8>}, {transform_indices = @transform_4, window_bounds = array<i64: 1, 1, 8, 8>}]} {
    %c0_i32 = arith.constant 0 : i32
    %0 = arith.cmpi eq, %arg3, %c0_i32 : i32
    %1 = arith.extui %0 : i1 to i32
    %c0_i32_0 = arith.constant 0 : i32
    %2 = arith.cmpi ne, %1, %c0_i32_0 : i32
    scf.if %2 {
      %cst_42 = arith.constant 0xFF800000 : f32
      %42 = vector.broadcast %cst_42 : f32 to vector<1x8x1xf32>
      %c0_43 = arith.constant 0 : index
      %c0_44 = arith.constant 0 : index
      %c0_45 = arith.constant 0 : index
      %43 = vector.load %arg9[%c0_43, %c0_44, %c0_45] : memref<1x8x1xf32, #tpu.memory_space<vmem>>, vector<1x8x1xf32>
      tpu.vector_store %arg9[%c0_43, %c0_44, %c0_45], %42 {strides = array<i32>} : memref<1x8x1xf32, #tpu.memory_space<vmem>>, vector<1x8x1xf32>,
      %cst_46 = arith.constant 0.000000e+00 : f32
      %44 = vector.broadcast %cst_46 : f32 to vector<1x8x1xf32>
      %c0_47 = arith.constant 0 : index
      %c0_48 = arith.constant 0 : index
      %c0_49 = arith.constant 0 : index
      %45 = vector.load %arg10[%c0_47, %c0_48, %c0_49] : memref<1x8x1xf32, #tpu.memory_space<vmem>>, vector<1x8x1xf32>
      tpu.vector_store %arg10[%c0_47, %c0_48, %c0_49], %44 {strides = array<i32>} : memref<1x8x1xf32, #tpu.memory_space<vmem>>, vector<1x8x1xf32>,
      %cst_50 = arith.constant 0.000000e+00 : f32
      %46 = vector.broadcast %cst_50 : f32 to vector<1x8x8xf32>
      %c0_51 = arith.constant 0 : index
      %c0_52 = arith.constant 0 : index
      %c0_53 = arith.constant 0 : index
      %47 = vector.load %arg11[%c0_51, %c0_52, %c0_53] : memref<1x8x8xf32, #tpu.memory_space<vmem>>, vector<1x8x8xf32>
      tpu.vector_store %arg11[%c0_51, %c0_52, %c0_53], %46 {strides = array<i32>} : memref<1x8x8xf32, #tpu.memory_space<vmem>>, vector<1x8x8xf32>,
    } else {
    }
    %c0 = arith.constant 0 : index
    %c0_1 = arith.constant 0 : index
    %c0_2 = arith.constant 0 : index
    %c0_3 = arith.constant 0 : index
    %3 = vector.load %arg4[%c0, %c0_1, %c0_2, %c0_3] : memref<1x1x8x8xbf16, #tpu.memory_space<vmem>>, vector<1x1x8x8xbf16>
    %4 = vector.shape_cast %3 : vector<1x1x8x8xbf16> to vector<1x8x8xbf16>
    %c0_4 = arith.constant 0 : index
    %c0_5 = arith.constant 0 : index
    %c0_6 = arith.constant 0 : index
    %c0_7 = arith.constant 0 : index
    %5 = vector.load %arg5[%c0_4, %c0_5, %c0_6, %c0_7] : memref<1x1x8x8xbf16, #tpu.memory_space<vmem>>, vector<1x1x8x8xbf16>
    %6 = vector.shape_cast %5 : vector<1x1x8x8xbf16> to vector<1x8x8xbf16>
    "tpu.trace_start"() <{level = 10 : i32, message = "bqd,bkd->bqk"}> : () -> ()
    %cst = arith.constant dense<0.000000e+00> : vector<1x8x8xf32>
    %7 = tpu.matmul %4, %6, %cst {dimension_numbers = #tpu.dot_dimension_numbers<[2], [2], [1], [1], [0, 0, 0, 1, 1, 1], [0], [0]>} : vector<1x8x8xbf16>, vector<1x8x8xbf16>, vector<1x8x8xf32> -> vector<1x8x8xf32>
    "tpu.trace_stop"() : () -> ()
    %cst_8 = arith.constant 0.353553385 : f32
    %8 = vector.broadcast %cst_8 : f32 to vector<1x8x8xf32>
    %9 = arith.mulf %7, %8 : vector<1x8x8xf32>
    %c0_9 = arith.constant 0 : index
    %c0_10 = arith.constant 0 : index
    %c0_11 = arith.constant 0 : index
    %10 = vector.load %arg7[%c0_9, %c0_10, %c0_11] : memref<1x1x8xf32, #tpu.memory_space<vmem>>, vector<1x1x8xf32>
    %11 = vector.broadcast %10 : vector<1x1x8xf32> to vector<1x8x8xf32>
    %12 = arith.addf %9, %11 : vector<1x8x8xf32>
    %c0_12 = arith.constant 0 : index
    %c0_13 = arith.constant 0 : index
    %c0_14 = arith.constant 0 : index
    %13 = vector.load %arg9[%c0_12, %c0_13, %c0_14] : memref<1x8x1xf32, #tpu.memory_space<vmem>>, vector<1x8x1xf32>
    %cst_15 = arith.constant dense<0xFF800000> : vector<1x8xf32>
    %14 = vector.multi_reduction <maximumf>, %12, %cst_15 [2] : vector<1x8x8xf32> to vector<1x8xf32>
    %15 = vector.shape_cast %14 : vector<1x8xf32> to vector<1x8x1xf32>
    %16 = arith.maximumf %13, %15 : vector<1x8x1xf32>
    %c0_16 = arith.constant 0 : index
    %c0_17 = arith.constant 0 : index
    %c0_18 = arith.constant 0 : index
    %17 = vector.load %arg9[%c0_16, %c0_17, %c0_18] : memref<1x8x1xf32, #tpu.memory_space<vmem>>, vector<1x8x1xf32>
    %18 = arith.subf %17, %16 : vector<1x8x1xf32>
    %19 = math.exp %18 : vector<1x8x1xf32>
    %20 = vector.broadcast %16 : vector<1x8x1xf32> to vector<1x8x8xf32>
    %21 = arith.subf %12, %20 : vector<1x8x8xf32>
    %22 = math.exp %21 : vector<1x8x8xf32>
    %c0_19 = arith.constant 0 : index
    %c0_20 = arith.constant 0 : index
    %c0_21 = arith.constant 0 : index
    %23 = vector.load %arg10[%c0_19, %c0_20, %c0_21] : memref<1x8x1xf32, #tpu.memory_space<vmem>>, vector<1x8x1xf32>
    %24 = arith.mulf %19, %23 : vector<1x8x1xf32>
    %cst_22 = arith.constant dense<0.000000e+00> : vector<1x8xf32>
    %25 = vector.multi_reduction <add>, %22, %cst_22 [2] : vector<1x8x8xf32> to vector<1x8xf32>
    %26 = vector.shape_cast %25 : vector<1x8xf32> to vector<1x8x1xf32>
    %27 = arith.addf %24, %26 : vector<1x8x1xf32>
    %c0_23 = arith.constant 0 : index
    %c0_24 = arith.constant 0 : index
    %c0_25 = arith.constant 0 : index
    %28 = vector.load %arg10[%c0_23, %c0_24, %c0_25] : memref<1x8x1xf32, #tpu.memory_space<vmem>>, vector<1x8x1xf32>
    tpu.vector_store %arg10[%c0_23, %c0_24, %c0_25], %27 {strides = array<i32>} : memref<1x8x1xf32, #tpu.memory_space<vmem>>, vector<1x8x1xf32>,
    %c0_26 = arith.constant 0 : index
    %c0_27 = arith.constant 0 : index
    %c0_28 = arith.constant 0 : index
    %29 = vector.load %arg11[%c0_26, %c0_27, %c0_28] : memref<1x8x8xf32, #tpu.memory_space<vmem>>, vector<1x8x8xf32>
    %30 = vector.broadcast %19 : vector<1x8x1xf32> to vector<1x8x8xf32>
    %31 = arith.mulf %30, %29 : vector<1x8x8xf32>
    %32 = arith.truncf %22 : vector<1x8x8xf32> to vector<1x8x8xbf16>
    %c0_29 = arith.constant 0 : index
    %c0_30 = arith.constant 0 : index
    %c0_31 = arith.constant 0 : index
    %c0_32 = arith.constant 0 : index
    %33 = vector.load %arg6[%c0_29, %c0_30, %c0_31, %c0_32] : memref<1x1x8x8xbf16, #tpu.memory_space<vmem>>, vector<1x1x8x8xbf16>
    %34 = vector.shape_cast %33 : vector<1x1x8x8xbf16> to vector<1x8x8xbf16>
    "tpu.trace_start"() <{level = 10 : i32, message = "bqk,bkd->bqd"}> : () -> ()
    %cst_33 = arith.constant dense<0.000000e+00> : vector<1x8x8xf32>
    %35 = tpu.matmul %32, %34, %cst_33 {dimension_numbers = #tpu.dot_dimension_numbers<[2], [1], [1], [2], [0, 0, 0, 1, 1, 2], [0], [0]>} : vector<1x8x8xbf16>, vector<1x8x8xbf16>, vector<1x8x8xf32> -> vector<1x8x8xf32>
    "tpu.trace_stop"() : () -> ()
    %36 = arith.addf %31, %35 : vector<1x8x8xf32>
    %c0_34 = arith.constant 0 : index
    %c0_35 = arith.constant 0 : index
    %c0_36 = arith.constant 0 : index
    %37 = vector.load %arg11[%c0_34, %c0_35, %c0_36] : memref<1x8x8xf32, #tpu.memory_space<vmem>>, vector<1x8x8xf32>
    tpu.vector_store %arg11[%c0_34, %c0_35, %c0_36], %36 {strides = array<i32>} : memref<1x8x8xf32, #tpu.memory_space<vmem>>, vector<1x8x8xf32>,
    %c0_37 = arith.constant 0 : index
    %c0_38 = arith.constant 0 : index
    %c0_39 = arith.constant 0 : index
    %38 = vector.load %arg9[%c0_37, %c0_38, %c0_39] : memref<1x8x1xf32, #tpu.memory_space<vmem>>, vector<1x8x1xf32>
    tpu.vector_store %arg9[%c0_37, %c0_38, %c0_39], %16 {strides = array<i32>} : memref<1x8x1xf32, #tpu.memory_space<vmem>>, vector<1x8x1xf32>,
    %c0_i32_40 = arith.constant 0 : i32
    %39 = arith.cmpi eq, %arg3, %c0_i32_40 : i32
    %40 = arith.extui %39 : i1 to i32
    %c0_i32_41 = arith.constant 0 : i32
    %41 = arith.cmpi ne, %40, %c0_i32_41 : i32
    scf.if %41 {
      %c0_42 = arith.constant 0 : index
      %c0_43 = arith.constant 0 : index
      %c0_44 = arith.constant 0 : index
      %42 = vector.load %arg11[%c0_42, %c0_43, %c0_44] : memref<1x8x8xf32, #tpu.memory_space<vmem>>, vector<1x8x8xf32>
      %c0_45 = arith.constant 0 : index
      %c0_46 = arith.constant 0 : index
      %c0_47 = arith.constant 0 : index
      %43 = vector.load %arg10[%c0_45, %c0_46, %c0_47] : memref<1x8x1xf32, #tpu.memory_space<vmem>>, vector<1x8x1xf32>
      %44 = tpu.reciprocal %43 {approx = true} : vector<1x8x1xf32> -> vector<1x8x1xf32>
      %45 = vector.broadcast %44 : vector<1x8x1xf32> to vector<1x8x8xf32>
      %46 = arith.mulf %42, %45 : vector<1x8x8xf32>
      %47 = arith.truncf %46 : vector<1x8x8xf32> to vector<1x8x8xbf16>
      %c0_48 = arith.constant 0 : index
      %c0_49 = arith.constant 0 : index
      %c0_50 = arith.constant 0 : index
      %c0_51 = arith.constant 0 : index
      %48 = vector.load %arg8[%c0_48, %c0_49, %c0_50, %c0_51] : memref<1x1x8x8xbf16, #tpu.memory_space<vmem>>, vector<1x1x8x8xbf16>
      %49 = vector.shape_cast %48 : vector<1x1x8x8xbf16> to vector<1x8x8xbf16>
      %50 = vector.shape_cast %47 : vector<1x8x8xbf16> to vector<1x1x8x8xbf16>
      tpu.vector_store %arg8[%c0_48, %c0_49, %c0_50, %c0_51], %50 {strides = array<i32>} : memref<1x1x8x8xbf16, #tpu.memory_space<vmem>>, vector<1x1x8x8xbf16>,
    } else {
    }
    return
  }
  func.func @transform_0(%arg0: i32, %arg1: i32, %arg2: i32, %arg3: i32) -> (i32, i32, i32, i32) {
    %c0_i32 = arith.constant 0 : i32
    %c0_i32_0 = arith.constant 0 : i32
    return %arg0, %arg1, %arg2, %c0_i32 : i32, i32, i32, i32
  }
  func.func @transform_1(%arg0: i32, %arg1: i32, %arg2: i32, %arg3: i32) -> (i32, i32, i32, i32) {
    %c4_i32 = arith.constant 4 : i32
    %0 = arith.addi %c4_i32, %arg0 : i32
    %c0_i32 = arith.constant 0 : i32
    %c0_i32_0 = arith.constant 0 : i32
    return %0, %arg1, %arg3, %c0_i32 : i32, i32, i32, i32
  }
  func.func @transform_2(%arg0: i32, %arg1: i32, %arg2: i32, %arg3: i32) -> (i32, i32, i32, i32) {
    %c8_i32 = arith.constant 8 : i32
    %0 = arith.addi %c8_i32, %arg0 : i32
    %c0_i32 = arith.constant 0 : i32
    %c0_i32_0 = arith.constant 0 : i32
    return %0, %arg1, %arg3, %c0_i32 : i32, i32, i32, i32
  }
  func.func @transform_3(%arg0: i32, %arg1: i32, %arg2: i32, %arg3: i32) -> (i32, i32, i32) {
    %c0_i32 = arith.constant 0 : i32
    %c0_i32_0 = arith.constant 0 : i32
    return %arg1, %c0_i32, %arg3 : i32, i32, i32
  }
  func.func @transform_4(%arg0: i32, %arg1: i32, %arg2: i32, %arg3: i32) -> (i32, i32, i32, i32) {
    %c0_i32 = arith.constant 0 : i32
    %c0_i32_0 = arith.constant 0 : i32
    return %arg0, %arg1, %arg2, %c0_i32 : i32, i32, i32, i32
  }
}

module attributes {stable_mosaic.version = 11 : i64} {
  func.func @_layernorm_kernel(%arg0: i32, %arg1: memref<16x32xbf16, #tpu.memory_space<vmem>>, %arg2: memref<1x32xf32, #tpu.memory_space<vmem>>, %arg3: memref<1x32xf32, #tpu.memory_space<vmem>>, %arg4: memref<16x32xbf16, #tpu.memory_space<vmem>>) attributes {dimension_semantics = [#tpu.dimension_semantics<parallel>], iteration_bounds = array<i64: 1>, scalar_prefetch = 0 : i64, scratch_operands = 0 : i64, tpu.core_type = #tpu.core_type<tc>, window_params = [{transform_indices = @transform_0, window_bounds = array<i64: 16, 32>}, {pipeline_mode = #tpu.pipeline_mode<synchronous>, transform_indices = @transform_1, window_bounds = array<i64: 1, 32>}, {pipeline_mode = #tpu.pipeline_mode<synchronous>, transform_indices = @transform_2, window_bounds = array<i64: 1, 32>}, {transform_indices = @transform_3, window_bounds = array<i64: 16, 32>}]} {
    %c0 = arith.constant 0 : index
    %c0_0 = arith.constant 0 : index
    %0 = vector.load %arg1[%c0, %c0_0] : memref<16x32xbf16, #tpu.memory_space<vmem>>, vector<16x32xbf16>
    %1 = arith.extf %0 : vector<16x32xbf16> to vector<16x32xf32>
    %cst = arith.constant dense<0.000000e+00> : vector<16xf32>
    %2 = vector.multi_reduction <add>, %1, %cst [1] : vector<16x32xf32> to vector<16xf32>
    %3 = vector.shape_cast %2 : vector<16xf32> to vector<16x1xf32>
    %cst_1 = arith.constant 3.200000e+01 : f32
    %4 = vector.broadcast %cst_1 : f32 to vector<16x1xf32>
    %5 = arith.divf %3, %4 : vector<16x1xf32>
    %6 = vector.broadcast %5 : vector<16x1xf32> to vector<16x32xf32>
    %7 = arith.subf %1, %6 : vector<16x32xf32>
    %8 = arith.mulf %7, %7 : vector<16x32xf32>
    %cst_2 = arith.constant dense<0.000000e+00> : vector<16xf32>
    %9 = vector.multi_reduction <add>, %8, %cst_2 [1] : vector<16x32xf32> to vector<16xf32>
    %10 = vector.shape_cast %9 : vector<16xf32> to vector<16x1xf32>
    %cst_3 = arith.constant 3.200000e+01 : f32
    %11 = vector.broadcast %cst_3 : f32 to vector<16x1xf32>
    %12 = arith.divf %10, %11 : vector<16x1xf32>
    %13 = vector.broadcast %5 : vector<16x1xf32> to vector<16x32xf32>
    %14 = arith.subf %1, %13 : vector<16x32xf32>
    %cst_4 = arith.constant 1.000000e-07 : f32
    %15 = vector.broadcast %cst_4 : f32 to vector<16x1xf32>
    %16 = arith.addf %12, %15 : vector<16x1xf32>
    %17 = math.rsqrt %16 : vector<16x1xf32>
    %18 = vector.broadcast %17 : vector<16x1xf32> to vector<16x32xf32>
    %19 = arith.mulf %14, %18 : vector<16x32xf32>
    %c0_5 = arith.constant 0 : index
    %c0_6 = arith.constant 0 : index
    %20 = vector.load %arg2[%c0_5, %c0_6] : memref<1x32xf32, #tpu.memory_space<vmem>>, vector<1x32xf32>
    %21 = vector.broadcast %20 : vector<1x32xf32> to vector<16x32xf32>
    %22 = arith.mulf %19, %21 : vector<16x32xf32>
    %c0_7 = arith.constant 0 : index
    %c0_8 = arith.constant 0 : index
    %23 = vector.load %arg3[%c0_7, %c0_8] : memref<1x32xf32, #tpu.memory_space<vmem>>, vector<1x32xf32>
    %24 = vector.broadcast %23 : vector<1x32xf32> to vector<16x32xf32>
    %25 = arith.addf %22, %24 : vector<16x32xf32>
    %26 = arith.truncf %25 : vector<16x32xf32> to vector<16x32xbf16>
    %c0_9 = arith.constant 0 : index
    %c0_10 = arith.constant 0 : index
    %27 = vector.load %arg4[%c0_9, %c0_10] : memref<16x32xbf16, #tpu.memory_space<vmem>>, vector<16x32xbf16>
    tpu.vector_store %arg4[%c0_9, %c0_10], %26 {strides = array<i32>} : memref<16x32xbf16, #tpu.memory_space<vmem>>, vector<16x32xbf16>,
    return
  }
  func.func @transform_0(%arg0: i32) -> (i32, i32) {
    %c0_i32 = arith.constant 0 : i32
    %c0_i32_0 = arith.constant 0 : i32
    return %arg0, %c0_i32 : i32, i32
  }
  func.func @transform_1(%arg0: i32) -> (i32, i32) {
    %c0_i32 = arith.constant 0 : i32
    %c0_i32_0 = arith.constant 0 : i32
    %c0_i32_1 = arith.constant 0 : i32
    return %c0_i32, %c0_i32_0 : i32, i32
  }
  func.func @transform_2(%arg0: i32) -> (i32, i32) {
    %c0_i32 = arith.constant 0 : i32
    %c0_i32_0 = arith.constant 0 : i32
    %c0_i32_1 = arith.constant 0 : i32
    return %c0_i32, %c0_i32_0 : i32, i32
  }
  func.func @transform_3(%arg0: i32) -> (i32, i32) {
    %c0_i32 = arith.constant 0 : i32
    %c0_i32_0 = arith.constant 0 : i32
    return %arg0, %c0_i32 : i32, i32
  }
}

module attributes {stable_mosaic.version = 11 : i64} {
  func.func @_qkv_split_kernel(%arg0: i32, %arg1: i32, %arg2: i32, %arg3: i32, %arg4: memref<1x8x32xbf16, #tpu.memory_space<vmem>>, %arg5: memref<4x32x8xbf16, #tpu.memory_space<vmem>>, %arg6: memref<4x1x8xf32, #tpu.memory_space<vmem>>, %arg7: memref<4x1x8x8xbf16, #tpu.memory_space<vmem>>, %arg8: memref<4x8x8xf32, #tpu.memory_space<vmem>>) attributes {dimension_semantics = [#tpu.dimension_semantics<parallel>, #tpu.dimension_semantics<parallel>, #tpu.dimension_semantics<parallel>, #tpu.dimension_semantics<arbitrary>], iteration_bounds = array<i64: 3, 2, 1, 1>, scalar_prefetch = 0 : i64, scratch_operands = 1 : i64, tpu.core_type = #tpu.core_type<tc>, window_params = [{transform_indices = @transform_0, window_bounds = array<i64: 1, 8, 32>}, {transform_indices = @transform_1, window_bounds = array<i64: 4, 32, 8>}, {transform_indices = @transform_2, window_bounds = array<i64: 4, 1, 8>}, {transform_indices = @transform_3, window_bounds = array<i64: 4, 1, 8, 8>}]} {
    %c0_i32 = arith.constant 0 : i32
    %0 = arith.cmpi eq, %arg3, %c0_i32 : i32
    %1 = arith.extui %0 : i1 to i32
    %c0_i32_0 = arith.constant 0 : i32
    %2 = arith.cmpi ne, %1, %c0_i32_0 : i32
    scf.if %2 {
      %cst_41 = arith.constant 0.000000e+00 : f32
      %44 = vector.broadcast %cst_41 : f32 to vector<4x8x8xf32>
      %c0_42 = arith.constant 0 : index
      %c0_43 = arith.constant 0 : index
      %c0_44 = arith.constant 0 : index
      %45 = vector.load %arg8[%c0_42, %c0_43, %c0_44] : memref<4x8x8xf32, #tpu.memory_space<vmem>>, vector<4x8x8xf32>
      tpu.vector_store %arg8[%c0_42, %c0_43, %c0_44], %44 {strides = array<i32>} : memref<4x8x8xf32, #tpu.memory_space<vmem>>, vector<4x8x8xf32>,
    } else {
    }
    %c0 = arith.constant 0 : index
    %c0_1 = arith.constant 0 : index
    %c0_2 = arith.constant 0 : index
    %3 = vector.load %arg4[%c0, %c0_1, %c0_2] : memref<1x8x32xbf16, #tpu.memory_space<vmem>>, vector<1x8x32xbf16>
    %4 = vector.shape_cast %3 : vector<1x8x32xbf16> to vector<8x32xbf16>
    %c0_3 = arith.constant 0 : index
    %c0_4 = arith.constant 0 : index
    %c0_5 = arith.constant 0 : index
    %5 = vector.load %arg8[%c0_3, %c0_4, %c0_5] : memref<4x8x8xf32, #tpu.memory_space<vmem>>, vector<1x8x8xf32>
    %6 = vector.shape_cast %5 : vector<1x8x8xf32> to vector<8x8xf32>
    %c0_6 = arith.constant 0 : index
    %c0_7 = arith.constant 0 : index
    %c0_8 = arith.constant 0 : index
    %7 = vector.load %arg5[%c0_6, %c0_7, %c0_8] : memref<4x32x8xbf16, #tpu.memory_space<vmem>>, vector<1x32x8xbf16>
    %8 = vector.shape_cast %7 : vector<1x32x8xbf16> to vector<32x8xbf16>
    %cst = arith.constant dense<0.000000e+00> : vector<8x8xf32>
    %9 = tpu.matmul %4, %8, %cst {dimension_numbers = #tpu.dot_dimension_numbers<[1], [0], [0], [1], [0, 0, 1, 1], [], []>} : vector<8x32xbf16>, vector<32x8xbf16>, vector<8x8xf32> -> vector<8x8xf32>
    %10 = arith.addf %6, %9 : vector<8x8xf32>
    %c0_9 = arith.constant 0 : index
    %c0_10 = arith.constant 0 : index
    %c0_11 = arith.constant 0 : index
    %11 = vector.load %arg8[%c0_9, %c0_10, %c0_11] : memref<4x8x8xf32, #tpu.memory_space<vmem>>, vector<1x8x8xf32>
    %12 = vector.shape_cast %11 : vector<1x8x8xf32> to vector<8x8xf32>
    %13 = vector.shape_cast %10 : vector<8x8xf32> to vector<1x8x8xf32>
    tpu.vector_store %arg8[%c0_9, %c0_10, %c0_11], %13 {strides = array<i32>} : memref<4x8x8xf32, #tpu.memory_space<vmem>>, vector<1x8x8xf32>,
    %c1 = arith.constant 1 : index
    %c0_12 = arith.constant 0 : index
    %c0_13 = arith.constant 0 : index
    %14 = vector.load %arg8[%c1, %c0_12, %c0_13] : memref<4x8x8xf32, #tpu.memory_space<vmem>>, vector<1x8x8xf32>
    %15 = vector.shape_cast %14 : vector<1x8x8xf32> to vector<8x8xf32>
    %c1_14 = arith.constant 1 : index
    %c0_15 = arith.constant 0 : index
    %c0_16 = arith.constant 0 : index
    %16 = vector.load %arg5[%c1_14, %c0_15, %c0_16] : memref<4x32x8xbf16, #tpu.memory_space<vmem>>, vector<1x32x8xbf16>
    %17 = vector.shape_cast %16 : vector<1x32x8xbf16> to vector<32x8xbf16>
    %cst_17 = arith.constant dense<0.000000e+00> : vector<8x8xf32>
    %18 = tpu.matmul %4, %17, %cst_17 {dimension_numbers = #tpu.dot_dimension_numbers<[1], [0], [0], [1], [0, 0, 1, 1], [], []>} : vector<8x32xbf16>, vector<32x8xbf16>, vector<8x8xf32> -> vector<8x8xf32>
    %19 = arith.addf %15, %18 : vector<8x8xf32>
    %c1_18 = arith.constant 1 : index
    %c0_19 = arith.constant 0 : index
    %c0_20 = arith.constant 0 : index
    %20 = vector.load %arg8[%c1_18, %c0_19, %c0_20] : memref<4x8x8xf32, #tpu.memory_space<vmem>>, vector<1x8x8xf32>
    %21 = vector.shape_cast %20 : vector<1x8x8xf32> to vector<8x8xf32>
    %22 = vector.shape_cast %19 : vector<8x8xf32> to vector<1x8x8xf32>
    tpu.vector_store %arg8[%c1_18, %c0_19, %c0_20], %22 {strides = array<i32>} : memref<4x8x8xf32, #tpu.memory_space<vmem>>, vector<1x8x8xf32>,
    %c2 = arith.constant 2 : index
    %c0_21 = arith.constant 0 : index
    %c0_22 = arith.constant 0 : index
    %23 = vector.load %arg8[%c2, %c0_21, %c0_22] : memref<4x8x8xf32, #tpu.memory_space<vmem>>, vector<1x8x8xf32>
    %24 = vector.shape_cast %23 : vector<1x8x8xf32> to vector<8x8xf32>
    %c2_23 = arith.constant 2 : index
    %c0_24 = arith.constant 0 : index
    %c0_25 = arith.constant 0 : index
    %25 = vector.load %arg5[%c2_23, %c0_24, %c0_25] : memref<4x32x8xbf16, #tpu.memory_space<vmem>>, vector<1x32x8xbf16>
    %26 = vector.shape_cast %25 : vector<1x32x8xbf16> to vector<32x8xbf16>
    %cst_26 = arith.constant dense<0.000000e+00> : vector<8x8xf32>
    %27 = tpu.matmul %4, %26, %cst_26 {dimension_numbers = #tpu.dot_dimension_numbers<[1], [0], [0], [1], [0, 0, 1, 1], [], []>} : vector<8x32xbf16>, vector<32x8xbf16>, vector<8x8xf32> -> vector<8x8xf32>
    %28 = arith.addf %24, %27 : vector<8x8xf32>
    %c2_27 = arith.constant 2 : index
    %c0_28 = arith.constant 0 : index
    %c0_29 = arith.constant 0 : index
    %29 = vector.load %arg8[%c2_27, %c0_28, %c0_29] : memref<4x8x8xf32, #tpu.memory_space<vmem>>, vector<1x8x8xf32>
    %30 = vector.shape_cast %29 : vector<1x8x8xf32> to vector<8x8xf32>
    %31 = vector.shape_cast %28 : vector<8x8xf32> to vector<1x8x8xf32>
    tpu.vector_store %arg8[%c2_27, %c0_28, %c0_29], %31 {strides = array<i32>} : memref<4x8x8xf32, #tpu.memory_space<vmem>>, vector<1x8x8xf32>,
    %c3 = arith.constant 3 : index
    %c0_30 = arith.constant 0 : index
    %c0_31 = arith.constant 0 : index
    %32 = vector.load %arg8[%c3, %c0_30, %c0_31] : memref<4x8x8xf32, #tpu.memory_space<vmem>>, vector<1x8x8xf32>
    %33 = vector.shape_cast %32 : vector<1x8x8xf32> to vector<8x8xf32>
    %c3_32 = arith.constant 3 : index
    %c0_33 = arith.constant 0 : index
    %c0_34 = arith.constant 0 : index
    %34 = vector.load %arg5[%c3_32, %c0_33, %c0_34] : memref<4x32x8xbf16, #tpu.memory_space<vmem>>, vector<1x32x8xbf16>
    %35 = vector.shape_cast %34 : vector<1x32x8xbf16> to vector<32x8xbf16>
    %cst_35 = arith.constant dense<0.000000e+00> : vector<8x8xf32>
    %36 = tpu.matmul %4, %35, %cst_35 {dimension_numbers = #tpu.dot_dimension_numbers<[1], [0], [0], [1], [0, 0, 1, 1], [], []>} : vector<8x32xbf16>, vector<32x8xbf16>, vector<8x8xf32> -> vector<8x8xf32>
    %37 = arith.addf %33, %36 : vector<8x8xf32>
    %c3_36 = arith.constant 3 : index
    %c0_37 = arith.constant 0 : index
    %c0_38 = arith.constant 0 : index
    %38 = vector.load %arg8[%c3_36, %c0_37, %c0_38] : memref<4x8x8xf32, #tpu.memory_space<vmem>>, vector<1x8x8xf32>
    %39 = vector.shape_cast %38 : vector<1x8x8xf32> to vector<8x8xf32>
    %40 = vector.shape_cast %37 : vector<8x8xf32> to vector<1x8x8xf32>
    tpu.vector_store %arg8[%c3_36, %c0_37, %c0_38], %40 {strides = array<i32>} : memref<4x8x8xf32, #tpu.memory_space<vmem>>, vector<1x8x8xf32>,
    %c0_i32_39 = arith.constant 0 : i32
    %41 = arith.cmpi eq, %arg3, %c0_i32_39 : i32
    %42 = arith.extui %41 : i1 to i32
    %c0_i32_40 = arith.constant 0 : i32
    %43 = arith.cmpi ne, %42, %c0_i32_40 : i32
    scf.if %43 {
      %c0_41 = arith.constant 0 : index
      %c0_42 = arith.constant 0 : index
      %c0_43 = arith.constant 0 : index
      %44 = vector.load %arg8[%c0_41, %c0_42, %c0_43] : memref<4x8x8xf32, #tpu.memory_space<vmem>>, vector<1x8x8xf32>
      %45 = vector.shape_cast %44 : vector<1x8x8xf32> to vector<8x8xf32>
      %c0_44 = arith.constant 0 : index
      %c0_45 = arith.constant 0 : index
      %c0_46 = arith.constant 0 : index
      %46 = vector.load %arg6[%c0_44, %c0_45, %c0_46] : memref<4x1x8xf32, #tpu.memory_space<vmem>>, vector<1x1x8xf32>
      %47 = vector.shape_cast %46 : vector<1x1x8xf32> to vector<1x8xf32>
      %48 = vector.broadcast %47 : vector<1x8xf32> to vector<8x8xf32>
      %49 = arith.addf %45, %48 : vector<8x8xf32>
      %50 = arith.truncf %49 : vector<8x8xf32> to vector<8x8xbf16>
      %c0_47 = arith.constant 0 : index
      %c0_48 = arith.constant 0 : index
      %c0_49 = arith.constant 0 : index
      %c0_50 = arith.constant 0 : index
      %51 = vector.load %arg7[%c0_47, %c0_48, %c0_49, %c0_50] : memref<4x1x8x8xbf16, #tpu.memory_space<vmem>>, vector<1x1x8x8xbf16>
      %52 = vector.shape_cast %51 : vector<1x1x8x8xbf16> to vector<8x8xbf16>
      %53 = vector.shape_cast %50 : vector<8x8xbf16> to vector<1x1x8x8xbf16>
      tpu.vector_store %arg7[%c0_47, %c0_48, %c0_49, %c0_50], %53 {strides = array<i32>} : memref<4x1x8x8xbf16, #tpu.memory_space<vmem>>, vector<1x1x8x8xbf16>,
      %c1_51 = arith.constant 1 : index
      %c0_52 = arith.constant 0 : index
      %c0_53 = arith.constant 0 : index
      %54 = vector.load %arg8[%c1_51, %c0_52, %c0_53] : memref<4x8x8xf32, #tpu.memory_space<vmem>>, vector<1x8x8xf32>
      %55 = vector.shape_cast %54 : vector<1x8x8xf32> to vector<8x8xf32>
      %c1_54 = arith.constant 1 : index
      %c0_55 = arith.constant 0 : index
      %c0_56 = arith.constant 0 : index
      %56 = vector.load %arg6[%c1_54, %c0_55, %c0_56] : memref<4x1x8xf32, #tpu.memory_space<vmem>>, vector<1x1x8xf32>
      %57 = vector.shape_cast %56 : vector<1x1x8xf32> to vector<1x8xf32>
      %58 = vector.broadcast %57 : vector<1x8xf32> to vector<8x8xf32>
      %59 = arith.addf %55, %58 : vector<8x8xf32>
      %60 = arith.truncf %59 : vector<8x8xf32> to vector<8x8xbf16>
      %c1_57 = arith.constant 1 : index
      %c0_58 = arith.constant 0 : index
      %c0_59 = arith.constant 0 : index
      %c0_60 = arith.constant 0 : index
      %61 = vector.load %arg7[%c1_57, %c0_58, %c0_59, %c0_60] : memref<4x1x8x8xbf16, #tpu.memory_space<vmem>>, vector<1x1x8x8xbf16>
      %62 = vector.shape_cast %61 : vector<1x1x8x8xbf16> to vector<8x8xbf16>
      %63 = vector.shape_cast %60 : vector<8x8xbf16> to vector<1x1x8x8xbf16>
      tpu.vector_store %arg7[%c1_57, %c0_58, %c0_59, %c0_60], %63 {strides = array<i32>} : memref<4x1x8x8xbf16, #tpu.memory_space<vmem>>, vector<1x1x8x8xbf16>,
      %c2_61 = arith.constant 2 : index
      %c0_62 = arith.constant 0 : index
      %c0_63 = arith.constant 0 : index
      %64 = vector.load %arg8[%c2_61, %c0_62, %c0_63] : memref<4x8x8xf32, #tpu.memory_space<vmem>>, vector<1x8x8xf32>
      %65 = vector.shape_cast %64 : vector<1x8x8xf32> to vector<8x8xf32>
      %c2_64 = arith.constant 2 : index
      %c0_65 = arith.constant 0 : index
      %c0_66 = arith.constant 0 : index
      %66 = vector.load %arg6[%c2_64, %c0_65, %c0_66] : memref<4x1x8xf32, #tpu.memory_space<vmem>>, vector<1x1x8xf32>
      %67 = vector.shape_cast %66 : vector<1x1x8xf32> to vector<1x8xf32>
      %68 = vector.broadcast %67 : vector<1x8xf32> to vector<8x8xf32>
      %69 = arith.addf %65, %68 : vector<8x8xf32>
      %70 = arith.truncf %69 : vector<8x8xf32> to vector<8x8xbf16>
      %c2_67 = arith.constant 2 : index
      %c0_68 = arith.constant 0 : index
      %c0_69 = arith.constant 0 : index
      %c0_70 = arith.constant 0 : index
      %71 = vector.load %arg7[%c2_67, %c0_68, %c0_69, %c0_70] : memref<4x1x8x8xbf16, #tpu.memory_space<vmem>>, vector<1x1x8x8xbf16>
      %72 = vector.shape_cast %71 : vector<1x1x8x8xbf16> to vector<8x8xbf16>
      %73 = vector.shape_cast %70 : vector<8x8xbf16> to vector<1x1x8x8xbf16>
      tpu.vector_store %arg7[%c2_67, %c0_68, %c0_69, %c0_70], %73 {strides = array<i32>} : memref<4x1x8x8xbf16, #tpu.memory_space<vmem>>, vector<1x1x8x8xbf16>,
      %c3_71 = arith.constant 3 : index
      %c0_72 = arith.constant 0 : index
      %c0_73 = arith.constant 0 : index
      %74 = vector.load %arg8[%c3_71, %c0_72, %c0_73] : memref<4x8x8xf32, #tpu.memory_space<vmem>>, vector<1x8x8xf32>
      %75 = vector.shape_cast %74 : vector<1x8x8xf32> to vector<8x8xf32>
      %c3_74 = arith.constant 3 : index
      %c0_75 = arith.constant 0 : index
      %c0_76 = arith.constant 0 : index
      %76 = vector.load %arg6[%c3_74, %c0_75, %c0_76] : memref<4x1x8xf32, #tpu.memory_space<vmem>>, vector<1x1x8xf32>
      %77 = vector.shape_cast %76 : vector<1x1x8xf32> to vector<1x8xf32>
      %78 = vector.broadcast %77 : vector<1x8xf32> to vector<8x8xf32>
      %79 = arith.addf %75, %78 : vector<8x8xf32>
      %80 = arith.truncf %79 : vector<8x8xf32> to vector<8x8xbf16>
      %c3_77 = arith.constant 3 : index
      %c0_78 = arith.constant 0 : index
      %c0_79 = arith.constant 0 : index
      %c0_80 = arith.constant 0 : index
      %81 = vector.load %arg7[%c3_77, %c0_78, %c0_79, %c0_80] : memref<4x1x8x8xbf16, #tpu.memory_space<vmem>>, vector<1x1x8x8xbf16>
      %82 = vector.shape_cast %81 : vector<1x1x8x8xbf16> to vector<8x8xbf16>
      %83 = vector.shape_cast %80 : vector<8x8xbf16> to vector<1x1x8x8xbf16>
      tpu.vector_store %arg7[%c3_77, %c0_78, %c0_79, %c0_80], %83 {strides = array<i32>} : memref<4x1x8x8xbf16, #tpu.memory_space<vmem>>, vector<1x1x8x8xbf16>,
    } else {
    }
    return
  }
  func.func @transform_0(%arg0: i32, %arg1: i32, %arg2: i32, %arg3: i32) -> (i32, i32, i32) {
    %c0_i32 = arith.constant 0 : i32
    return %arg1, %arg2, %arg3 : i32, i32, i32
  }
  func.func @transform_1(%arg0: i32, %arg1: i32, %arg2: i32, %arg3: i32) -> (i32, i32, i32) {
    %c0_i32 = arith.constant 0 : i32
    %c0_i32_0 = arith.constant 0 : i32
    return %arg0, %arg3, %c0_i32 : i32, i32, i32
  }
  func.func @transform_2(%arg0: i32, %arg1: i32, %arg2: i32, %arg3: i32) -> (i32, i32, i32) {
    %c0_i32 = arith.constant 0 : i32
    %c0_i32_0 = arith.constant 0 : i32
    %c0_i32_1 = arith.constant 0 : i32
    return %arg0, %c0_i32, %c0_i32_0 : i32, i32, i32
  }
  func.func @transform_3(%arg0: i32, %arg1: i32, %arg2: i32, %arg3: i32) -> (i32, i32, i32, i32) {
    %c0_i32 = arith.constant 0 : i32
    %c0_i32_0 = arith.constant 0 : i32
    return %arg0, %arg1, %arg2, %c0_i32 : i32, i32, i32, i32
  }
}

module attributes {stable_mosaic.version = 11 : i64} {
  func.func @_oproj_res_ln_kernel(%arg0: i32, %arg1: i32, %arg2: i32, %arg3: memref<1x1x8x8xbf16, #tpu.memory_space<vmem>>, %arg4: memref<1x8x32xbf16, #tpu.memory_space<vmem>>, %arg5: memref<1x32xf32, #tpu.memory_space<vmem>>, %arg6: memref<1x8x32xbf16, #tpu.memory_space<vmem>>, %arg7: memref<1x32xf32, #tpu.memory_space<vmem>>, %arg8: memref<1x32xf32, #tpu.memory_space<vmem>>, %arg9: memref<1x8x32xbf16, #tpu.memory_space<vmem>>, %arg10: memref<8x32xf32, #tpu.memory_space<vmem>>) attributes {dimension_semantics = [#tpu.dimension_semantics<parallel>, #tpu.dimension_semantics<parallel>, #tpu.dimension_semantics<arbitrary>], iteration_bounds = array<i64: 2, 1, 4>, scalar_prefetch = 0 : i64, scratch_operands = 1 : i64, tpu.core_type = #tpu.core_type<tc>, window_params = [{transform_indices = @transform_0, window_bounds = array<i64: 1, 1, 8, 8>}, {transform_indices = @transform_1, window_bounds = array<i64: 1, 8, 32>}, {pipeline_mode = #tpu.pipeline_mode<synchronous>, transform_indices = @transform_2, window_bounds = array<i64: 1, 32>}, {transform_indices = @transform_3, window_bounds = array<i64: 1, 8, 32>}, {pipeline_mode = #tpu.pipeline_mode<synchronous>, transform_indices = @transform_4, window_bounds = array<i64: 1, 32>}, {pipeline_mode = #tpu.pipeline_mode<synchronous>, transform_indices = @transform_5, window_bounds = array<i64: 1, 32>}, {transform_indices = @transform_6, window_bounds = array<i64: 1, 8, 32>}]} {
    %c0_i32 = arith.constant 0 : i32
    %0 = arith.cmpi eq, %arg2, %c0_i32 : i32
    %1 = arith.extui %0 : i1 to i32
    %c0_i32_0 = arith.constant 0 : i32
    %2 = arith.cmpi ne, %1, %c0_i32_0 : i32
    scf.if %2 {
      %cst_12 = arith.constant 0.000000e+00 : f32
      %14 = vector.broadcast %cst_12 : f32 to vector<8x32xf32>
      %c0_13 = arith.constant 0 : index
      %c0_14 = arith.constant 0 : index
      %15 = vector.load %arg10[%c0_13, %c0_14] : memref<8x32xf32, #tpu.memory_space<vmem>>, vector<8x32xf32>
      tpu.vector_store %arg10[%c0_13, %c0_14], %14 {strides = array<i32>} : memref<8x32xf32, #tpu.memory_space<vmem>>, vector<8x32xf32>,
    } else {
    }
    %c0 = arith.constant 0 : index
    %c0_1 = arith.constant 0 : index
    %3 = vector.load %arg10[%c0, %c0_1] : memref<8x32xf32, #tpu.memory_space<vmem>>, vector<8x32xf32>
    %c0_2 = arith.constant 0 : index
    %c0_3 = arith.constant 0 : index
    %c0_4 = arith.constant 0 : index
    %c0_5 = arith.constant 0 : index
    %4 = vector.load %arg3[%c0_2, %c0_3, %c0_4, %c0_5] : memref<1x1x8x8xbf16, #tpu.memory_space<vmem>>, vector<1x1x8x8xbf16>
    %5 = vector.shape_cast %4 : vector<1x1x8x8xbf16> to vector<8x8xbf16>
    %c0_6 = arith.constant 0 : index
    %c0_7 = arith.constant 0 : index
    %c0_8 = arith.constant 0 : index
    %6 = vector.load %arg4[%c0_6, %c0_7, %c0_8] : memref<1x8x32xbf16, #tpu.memory_space<vmem>>, vector<1x8x32xbf16>
    %7 = vector.shape_cast %6 : vector<1x8x32xbf16> to vector<8x32xbf16>
    %cst = arith.constant dense<0.000000e+00> : vector<8x32xf32>
    %8 = tpu.matmul %5, %7, %cst {dimension_numbers = #tpu.dot_dimension_numbers<[1], [0], [0], [1], [0, 0, 1, 1], [], []>} : vector<8x8xbf16>, vector<8x32xbf16>, vector<8x32xf32> -> vector<8x32xf32>
    %9 = arith.addf %3, %8 : vector<8x32xf32>
    %c0_9 = arith.constant 0 : index
    %c0_10 = arith.constant 0 : index
    %10 = vector.load %arg10[%c0_9, %c0_10] : memref<8x32xf32, #tpu.memory_space<vmem>>, vector<8x32xf32>
    tpu.vector_store %arg10[%c0_9, %c0_10], %9 {strides = array<i32>} : memref<8x32xf32, #tpu.memory_space<vmem>>, vector<8x32xf32>,
    %c3_i32 = arith.constant 3 : i32
    %11 = arith.cmpi eq, %arg2, %c3_i32 : i32
    %12 = arith.extui %11 : i1 to i32
    %c0_i32_11 = arith.constant 0 : i32
    %13 = arith.cmpi ne, %12, %c0_i32_11 : i32
    scf.if %13 {
      %c0_12 = arith.constant 0 : index
      %c0_13 = arith.constant 0 : index
      %14 = vector.load %arg10[%c0_12, %c0_13] : memref<8x32xf32, #tpu.memory_space<vmem>>, vector<8x32xf32>
      %c0_14 = arith.constant 0 : index
      %c0_15 = arith.constant 0 : index
      %15 = vector.load %arg5[%c0_14, %c0_15] : memref<1x32xf32, #tpu.memory_space<vmem>>, vector<1x32xf32>
      %16 = vector.broadcast %15 : vector<1x32xf32> to vector<8x32xf32>
      %17 = arith.addf %14, %16 : vector<8x32xf32>
      %c0_16 = arith.constant 0 : index
      %c0_17 = arith.constant 0 : index
      %c0_18 = arith.constant 0 : index
      %18 = vector.load %arg6[%c0_16, %c0_17, %c0_18] : memref<1x8x32xbf16, #tpu.memory_space<vmem>>, vector<1x8x32xbf16>
      %19 = vector.shape_cast %18 : vector<1x8x32xbf16> to vector<8x32xbf16>
      %20 = arith.extf %19 : vector<8x32xbf16> to vector<8x32xf32>
      %21 = arith.addf %17, %20 : vector<8x32xf32>
      %cst_19 = arith.constant dense<0.000000e+00> : vector<8xf32>
      %22 = vector.multi_reduction <add>, %21, %cst_19 [1] : vector<8x32xf32> to vector<8xf32>
      %23 = vector.shape_cast %22 : vector<8xf32> to vector<8x1xf32>
      %cst_20 = arith.constant 3.200000e+01 : f32
      %24 = vector.broadcast %cst_20 : f32 to vector<8x1xf32>
      %25 = arith.divf %23, %24 : vector<8x1xf32>
      %26 = vector.broadcast %25 : vector<8x1xf32> to vector<8x32xf32>
      %27 = arith.subf %21, %26 : vector<8x32xf32>
      %28 = arith.mulf %27, %27 : vector<8x32xf32>
      %cst_21 = arith.constant dense<0.000000e+00> : vector<8xf32>
      %29 = vector.multi_reduction <add>, %28, %cst_21 [1] : vector<8x32xf32> to vector<8xf32>
      %30 = vector.shape_cast %29 : vector<8xf32> to vector<8x1xf32>
      %cst_22 = arith.constant 3.200000e+01 : f32
      %31 = vector.broadcast %cst_22 : f32 to vector<8x1xf32>
      %32 = arith.divf %30, %31 : vector<8x1xf32>
      %33 = vector.broadcast %25 : vector<8x1xf32> to vector<8x32xf32>
      %34 = arith.subf %21, %33 : vector<8x32xf32>
      %cst_23 = arith.constant 1.000000e-07 : f32
      %35 = vector.broadcast %cst_23 : f32 to vector<8x1xf32>
      %36 = arith.addf %32, %35 : vector<8x1xf32>
      %37 = math.rsqrt %36 : vector<8x1xf32>
      %38 = vector.broadcast %37 : vector<8x1xf32> to vector<8x32xf32>
      %39 = arith.mulf %34, %38 : vector<8x32xf32>
      %c0_24 = arith.constant 0 : index
      %c0_25 = arith.constant 0 : index
      %40 = vector.load %arg7[%c0_24, %c0_25] : memref<1x32xf32, #tpu.memory_space<vmem>>, vector<1x32xf32>
      %41 = vector.broadcast %40 : vector<1x32xf32> to vector<8x32xf32>
      %42 = arith.mulf %39, %41 : vector<8x32xf32>
      %c0_26 = arith.constant 0 : index
      %c0_27 = arith.constant 0 : index
      %43 = vector.load %arg8[%c0_26, %c0_27] : memref<1x32xf32, #tpu.memory_space<vmem>>, vector<1x32xf32>
      %44 = vector.broadcast %43 : vector<1x32xf32> to vector<8x32xf32>
      %45 = arith.addf %42, %44 : vector<8x32xf32>
      %46 = arith.truncf %45 : vector<8x32xf32> to vector<8x32xbf16>
      %c0_28 = arith.constant 0 : index
      %c0_29 = arith.constant 0 : index
      %c0_30 = arith.constant 0 : index
      %47 = vector.load %arg9[%c0_28, %c0_29, %c0_30] : memref<1x8x32xbf16, #tpu.memory_space<vmem>>, vector<1x8x32xbf16>
      %48 = vector.shape_cast %47 : vector<1x8x32xbf16> to vector<8x32xbf16>
      %49 = vector.shape_cast %46 : vector<8x32xbf16> to vector<1x8x32xbf16>
      tpu.vector_store %arg9[%c0_28, %c0_29, %c0_30], %49 {strides = array<i32>} : memref<1x8x32xbf16, #tpu.memory_space<vmem>>, vector<1x8x32xbf16>,
    } else {
    }
    return
  }
  func.func @transform_0(%arg0: i32, %arg1: i32, %arg2: i32) -> (i32, i32, i32, i32) {
    %c0_i32 = arith.constant 0 : i32
    %c0_i32_0 = arith.constant 0 : i32
    return %arg2, %arg0, %arg1, %c0_i32 : i32, i32, i32, i32
  }
  func.func @transform_1(%arg0: i32, %arg1: i32, %arg2: i32) -> (i32, i32, i32) {
    %c0_i32 = arith.constant 0 : i32
    %c0_i32_0 = arith.constant 0 : i32
    %c0_i32_1 = arith.constant 0 : i32
    return %arg2, %c0_i32, %c0_i32_0 : i32, i32, i32
  }
  func.func @transform_2(%arg0: i32, %arg1: i32, %arg2: i32) -> (i32, i32) {
    %c0_i32 = arith.constant 0 : i32
    %c0_i32_0 = arith.constant 0 : i32
    %c0_i32_1 = arith.constant 0 : i32
    return %c0_i32, %c0_i32_0 : i32, i32
  }
  func.func @transform_3(%arg0: i32, %arg1: i32, %arg2: i32) -> (i32, i32, i32) {
    %c0_i32 = arith.constant 0 : i32
    %c0_i32_0 = arith.constant 0 : i32
    return %arg0, %arg1, %c0_i32 : i32, i32, i32
  }
  func.func @transform_4(%arg0: i32, %arg1: i32, %arg2: i32) -> (i32, i32) {
    %c0_i32 = arith.constant 0 : i32
    %c0_i32_0 = arith.constant 0 : i32
    %c0_i32_1 = arith.constant 0 : i32
    return %c0_i32, %c0_i32_0 : i32, i32
  }
  func.func @transform_5(%arg0: i32, %arg1: i32, %arg2: i32) -> (i32, i32) {
    %c0_i32 = arith.constant 0 : i32
    %c0_i32_0 = arith.constant 0 : i32
    %c0_i32_1 = arith.constant 0 : i32
    return %c0_i32, %c0_i32_0 : i32, i32
  }
  func.func @transform_6(%arg0: i32, %arg1: i32, %arg2: i32) -> (i32, i32, i32) {
    %c0_i32 = arith.constant 0 : i32
    %c0_i32_0 = arith.constant 0 : i32
    return %arg0, %arg1, %c0_i32 : i32, i32, i32
  }
}

module attributes {stable_mosaic.version = 11 : i64} {
  func.func @_mm_bias_kernel(%arg0: i32, %arg1: i32, %arg2: i32, %arg3: memref<16x32xbf16, #tpu.memory_space<vmem>>, %arg4: memref<32x64xbf16, #tpu.memory_space<vmem>>, %arg5: memref<1x64xf32, #tpu.memory_space<vmem>>, %arg6: memref<16x64xbf16, #tpu.memory_space<vmem>>, %arg7: memref<16x64xf32, #tpu.memory_space<vmem>>) attributes {dimension_semantics = [#tpu.dimension_semantics<parallel>, #tpu.dimension_semantics<parallel>, #tpu.dimension_semantics<arbitrary>], iteration_bounds = array<i64: 1, 1, 1>, scalar_prefetch = 0 : i64, scratch_operands = 1 : i64, tpu.core_type = #tpu.core_type<tc>, window_params = [{transform_indices = @transform_0, window_bounds = array<i64: 16, 32>}, {transform_indices = @transform_1, window_bounds = array<i64: 32, 64>}, {transform_indices = @transform_2, window_bounds = array<i64: 1, 64>}, {transform_indices = @transform_3, window_bounds = array<i64: 16, 64>}]} {
    %c0_i32 = arith.constant 0 : i32
    %0 = arith.cmpi eq, %arg2, %c0_i32 : i32
    %1 = arith.extui %0 : i1 to i32
    %c0_i32_0 = arith.constant 0 : i32
    %2 = arith.cmpi ne, %1, %c0_i32_0 : i32
    scf.if %2 {
      %cst_10 = arith.constant 0.000000e+00 : f32
      %12 = vector.broadcast %cst_10 : f32 to vector<16x64xf32>
      %c0_11 = arith.constant 0 : index
      %c0_12 = arith.constant 0 : index
      %13 = vector.load %arg7[%c0_11, %c0_12] : memref<16x64xf32, #tpu.memory_space<vmem>>, vector<16x64xf32>
      tpu.vector_store %arg7[%c0_11, %c0_12], %12 {strides = array<i32>} : memref<16x64xf32, #tpu.memory_space<vmem>>, vector<16x64xf32>,
    } else {
    }
    %c0 = arith.constant 0 : index
    %c0_1 = arith.constant 0 : index
    %3 = vector.load %arg7[%c0, %c0_1] : memref<16x64xf32, #tpu.memory_space<vmem>>, vector<16x64xf32>
    %c0_2 = arith.constant 0 : index
    %c0_3 = arith.constant 0 : index
    %4 = vector.load %arg3[%c0_2, %c0_3] : memref<16x32xbf16, #tpu.memory_space<vmem>>, vector<16x32xbf16>
    %c0_4 = arith.constant 0 : index
    %c0_5 = arith.constant 0 : index
    %5 = vector.load %arg4[%c0_4, %c0_5] : memref<32x64xbf16, #tpu.memory_space<vmem>>, vector<32x64xbf16>
    %cst = arith.constant dense<0.000000e+00> : vector<16x64xf32>
    %6 = tpu.matmul %4, %5, %cst {dimension_numbers = #tpu.dot_dimension_numbers<[1], [0], [0], [1], [0, 0, 1, 1], [], []>} : vector<16x32xbf16>, vector<32x64xbf16>, vector<16x64xf32> -> vector<16x64xf32>
    %7 = arith.addf %3, %6 : vector<16x64xf32>
    %c0_6 = arith.constant 0 : index
    %c0_7 = arith.constant 0 : index
    %8 = vector.load %arg7[%c0_6, %c0_7] : memref<16x64xf32, #tpu.memory_space<vmem>>, vector<16x64xf32>
    tpu.vector_store %arg7[%c0_6, %c0_7], %7 {strides = array<i32>} : memref<16x64xf32, #tpu.memory_space<vmem>>, vector<16x64xf32>,
    %c0_i32_8 = arith.constant 0 : i32
    %9 = arith.cmpi eq, %arg2, %c0_i32_8 : i32
    %10 = arith.extui %9 : i1 to i32
    %c0_i32_9 = arith.constant 0 : i32
    %11 = arith.cmpi ne, %10, %c0_i32_9 : i32
    scf.if %11 {
      %c0_10 = arith.constant 0 : index
      %c0_11 = arith.constant 0 : index
      %12 = vector.load %arg7[%c0_10, %c0_11] : memref<16x64xf32, #tpu.memory_space<vmem>>, vector<16x64xf32>
      %c0_12 = arith.constant 0 : index
      %c0_13 = arith.constant 0 : index
      %13 = vector.load %arg5[%c0_12, %c0_13] : memref<1x64xf32, #tpu.memory_space<vmem>>, vector<1x64xf32>
      %14 = vector.broadcast %13 : vector<1x64xf32> to vector<16x64xf32>
      %15 = arith.addf %12, %14 : vector<16x64xf32>
      %16 = arith.mulf %15, %15 : vector<16x64xf32>
      %17 = arith.mulf %15, %16 : vector<16x64xf32>
      %cst_14 = arith.constant 4.471500e-02 : f32
      %18 = vector.broadcast %cst_14 : f32 to vector<16x64xf32>
      %19 = arith.mulf %18, %17 : vector<16x64xf32>
      %20 = arith.addf %15, %19 : vector<16x64xf32>
      %cst_15 = arith.constant 0.797884583 : f32
      %21 = vector.broadcast %cst_15 : f32 to vector<16x64xf32>
      %22 = arith.mulf %21, %20 : vector<16x64xf32>
      %23 = math.tanh %22 : vector<16x64xf32>
      %cst_16 = arith.constant 1.000000e+00 : f32
      %24 = vector.broadcast %cst_16 : f32 to vector<16x64xf32>
      %25 = arith.addf %24, %23 : vector<16x64xf32>
      %cst_17 = arith.constant 5.000000e-01 : f32
      %26 = vector.broadcast %cst_17 : f32 to vector<16x64xf32>
      %27 = arith.mulf %26, %25 : vector<16x64xf32>
      %28 = arith.mulf %15, %27 : vector<16x64xf32>
      %29 = arith.truncf %28 : vector<16x64xf32> to vector<16x64xbf16>
      %c0_18 = arith.constant 0 : index
      %c0_19 = arith.constant 0 : index
      %30 = vector.load %arg6[%c0_18, %c0_19] : memref<16x64xbf16, #tpu.memory_space<vmem>>, vector<16x64xbf16>
      tpu.vector_store %arg6[%c0_18, %c0_19], %29 {strides = array<i32>} : memref<16x64xbf16, #tpu.memory_space<vmem>>, vector<16x64xbf16>,
    } else {
    }
    return
  }
  func.func @transform_0(%arg0: i32, %arg1: i32, %arg2: i32) -> (i32, i32) {
    %c0_i32 = arith.constant 0 : i32
    return %arg0, %arg2 : i32, i32
  }
  func.func @transform_1(%arg0: i32, %arg1: i32, %arg2: i32) -> (i32, i32) {
    %c0_i32 = arith.constant 0 : i32
    return %arg2, %arg1 : i32, i32
  }
  func.func @transform_2(%arg0: i32, %arg1: i32, %arg2: i32) -> (i32, i32) {
    %c0_i32 = arith.constant 0 : i32
    %c0_i32_0 = arith.constant 0 : i32
    return %c0_i32, %arg1 : i32, i32
  }
  func.func @transform_3(%arg0: i32, %arg1: i32, %arg2: i32) -> (i32, i32) {
    %c0_i32 = arith.constant 0 : i32
    return %arg0, %arg1 : i32, i32
  }
}

module attributes {stable_mosaic.version = 11 : i64} {
  func.func @_mm_res_ln_kernel(%arg0: i32, %arg1: i32, %arg2: memref<16x64xbf16, #tpu.memory_space<vmem>>, %arg3: memref<64x32xbf16, #tpu.memory_space<vmem>>, %arg4: memref<1x32xf32, #tpu.memory_space<vmem>>, %arg5: memref<16x32xbf16, #tpu.memory_space<vmem>>, %arg6: memref<1x32xf32, #tpu.memory_space<vmem>>, %arg7: memref<1x32xf32, #tpu.memory_space<vmem>>, %arg8: memref<16x32xbf16, #tpu.memory_space<vmem>>, %arg9: memref<16x32xf32, #tpu.memory_space<vmem>>) attributes {dimension_semantics = [#tpu.dimension_semantics<parallel>, #tpu.dimension_semantics<arbitrary>], iteration_bounds = array<i64: 1, 1>, scalar_prefetch = 0 : i64, scratch_operands = 1 : i64, tpu.core_type = #tpu.core_type<tc>, window_params = [{transform_indices = @transform_0, window_bounds = array<i64: 16, 64>}, {transform_indices = @transform_1, window_bounds = array<i64: 64, 32>}, {pipeline_mode = #tpu.pipeline_mode<synchronous>, transform_indices = @transform_2, window_bounds = array<i64: 1, 32>}, {transform_indices = @transform_3, window_bounds = array<i64: 16, 32>}, {pipeline_mode = #tpu.pipeline_mode<synchronous>, transform_indices = @transform_4, window_bounds = array<i64: 1, 32>}, {pipeline_mode = #tpu.pipeline_mode<synchronous>, transform_indices = @transform_5, window_bounds = array<i64: 1, 32>}, {transform_indices = @transform_6, window_bounds = array<i64: 16, 32>}]} {
    %c0_i32 = arith.constant 0 : i32
    %0 = arith.cmpi eq, %arg1, %c0_i32 : i32
    %1 = arith.extui %0 : i1 to i32
    %c0_i32_0 = arith.constant 0 : i32
    %2 = arith.cmpi ne, %1, %c0_i32_0 : i32
    scf.if %2 {
      %cst_10 = arith.constant 0.000000e+00 : f32
      %12 = vector.broadcast %cst_10 : f32 to vector<16x32xf32>
      %c0_11 = arith.constant 0 : index
      %c0_12 = arith.constant 0 : index
      %13 = vector.load %arg9[%c0_11, %c0_12] : memref<16x32xf32, #tpu.memory_space<vmem>>, vector<16x32xf32>
      tpu.vector_store %arg9[%c0_11, %c0_12], %12 {strides = array<i32>} : memref<16x32xf32, #tpu.memory_space<vmem>>, vector<16x32xf32>,
    } else {
    }
    %c0 = arith.constant 0 : index
    %c0_1 = arith.constant 0 : index
    %3 = vector.load %arg9[%c0, %c0_1] : memref<16x32xf32, #tpu.memory_space<vmem>>, vector<16x32xf32>
    %c0_2 = arith.constant 0 : index
    %c0_3 = arith.constant 0 : index
    %4 = vector.load %arg2[%c0_2, %c0_3] : memref<16x64xbf16, #tpu.memory_space<vmem>>, vector<16x64xbf16>
    %c0_4 = arith.constant 0 : index
    %c0_5 = arith.constant 0 : index
    %5 = vector.load %arg3[%c0_4, %c0_5] : memref<64x32xbf16, #tpu.memory_space<vmem>>, vector<64x32xbf16>
    %cst = arith.constant dense<0.000000e+00> : vector<16x32xf32>
    %6 = tpu.matmul %4, %5, %cst {dimension_numbers = #tpu.dot_dimension_numbers<[1], [0], [0], [1], [0, 0, 1, 1], [], []>} : vector<16x64xbf16>, vector<64x32xbf16>, vector<16x32xf32> -> vector<16x32xf32>
    %7 = arith.addf %3, %6 : vector<16x32xf32>
    %c0_6 = arith.constant 0 : index
    %c0_7 = arith.constant 0 : index
    %8 = vector.load %arg9[%c0_6, %c0_7] : memref<16x32xf32, #tpu.memory_space<vmem>>, vector<16x32xf32>
    tpu.vector_store %arg9[%c0_6, %c0_7], %7 {strides = array<i32>} : memref<16x32xf32, #tpu.memory_space<vmem>>, vector<16x32xf32>,
    %c0_i32_8 = arith.constant 0 : i32
    %9 = arith.cmpi eq, %arg1, %c0_i32_8 : i32
    %10 = arith.extui %9 : i1 to i32
    %c0_i32_9 = arith.constant 0 : i32
    %11 = arith.cmpi ne, %10, %c0_i32_9 : i32
    scf.if %11 {
      %c0_10 = arith.constant 0 : index
      %c0_11 = arith.constant 0 : index
      %12 = vector.load %arg9[%c0_10, %c0_11] : memref<16x32xf32, #tpu.memory_space<vmem>>, vector<16x32xf32>
      %c0_12 = arith.constant 0 : index
      %c0_13 = arith.constant 0 : index
      %13 = vector.load %arg4[%c0_12, %c0_13] : memref<1x32xf32, #tpu.memory_space<vmem>>, vector<1x32xf32>
      %14 = vector.broadcast %13 : vector<1x32xf32> to vector<16x32xf32>
      %15 = arith.addf %12, %14 : vector<16x32xf32>
      %c0_14 = arith.constant 0 : index
      %c0_15 = arith.constant 0 : index
      %16 = vector.load %arg5[%c0_14, %c0_15] : memref<16x32xbf16, #tpu.memory_space<vmem>>, vector<16x32xbf16>
      %17 = arith.extf %16 : vector<16x32xbf16> to vector<16x32xf32>
      %18 = arith.addf %15, %17 : vector<16x32xf32>
      %cst_16 = arith.constant dense<0.000000e+00> : vector<16xf32>
      %19 = vector.multi_reduction <add>, %18, %cst_16 [1] : vector<16x32xf32> to vector<16xf32>
      %20 = vector.shape_cast %19 : vector<16xf32> to vector<16x1xf32>
      %cst_17 = arith.constant 3.200000e+01 : f32
      %21 = vector.broadcast %cst_17 : f32 to vector<16x1xf32>
      %22 = arith.divf %20, %21 : vector<16x1xf32>
      %23 = vector.broadcast %22 : vector<16x1xf32> to vector<16x32xf32>
      %24 = arith.subf %18, %23 : vector<16x32xf32>
      %25 = arith.mulf %24, %24 : vector<16x32xf32>
      %cst_18 = arith.constant dense<0.000000e+00> : vector<16xf32>
      %26 = vector.multi_reduction <add>, %25, %cst_18 [1] : vector<16x32xf32> to vector<16xf32>
      %27 = vector.shape_cast %26 : vector<16xf32> to vector<16x1xf32>
      %cst_19 = arith.constant 3.200000e+01 : f32
      %28 = vector.broadcast %cst_19 : f32 to vector<16x1xf32>
      %29 = arith.divf %27, %28 : vector<16x1xf32>
      %30 = vector.broadcast %22 : vector<16x1xf32> to vector<16x32xf32>
      %31 = arith.subf %18, %30 : vector<16x32xf32>
      %cst_20 = arith.constant 1.000000e-07 : f32
      %32 = vector.broadcast %cst_20 : f32 to vector<16x1xf32>
      %33 = arith.addf %29, %32 : vector<16x1xf32>
      %34 = math.rsqrt %33 : vector<16x1xf32>
      %35 = vector.broadcast %34 : vector<16x1xf32> to vector<16x32xf32>
      %36 = arith.mulf %31, %35 : vector<16x32xf32>
      %c0_21 = arith.constant 0 : index
      %c0_22 = arith.constant 0 : index
      %37 = vector.load %arg6[%c0_21, %c0_22] : memref<1x32xf32, #tpu.memory_space<vmem>>, vector<1x32xf32>
      %38 = vector.broadcast %37 : vector<1x32xf32> to vector<16x32xf32>
      %39 = arith.mulf %36, %38 : vector<16x32xf32>
      %c0_23 = arith.constant 0 : index
      %c0_24 = arith.constant 0 : index
      %40 = vector.load %arg7[%c0_23, %c0_24] : memref<1x32xf32, #tpu.memory_space<vmem>>, vector<1x32xf32>
      %41 = vector.broadcast %40 : vector<1x32xf32> to vector<16x32xf32>
      %42 = arith.addf %39, %41 : vector<16x32xf32>
      %43 = arith.truncf %42 : vector<16x32xf32> to vector<16x32xbf16>
      %c0_25 = arith.constant 0 : index
      %c0_26 = arith.constant 0 : index
      %44 = vector.load %arg8[%c0_25, %c0_26] : memref<16x32xbf16, #tpu.memory_space<vmem>>, vector<16x32xbf16>
      tpu.vector_store %arg8[%c0_25, %c0_26], %43 {strides = array<i32>} : memref<16x32xbf16, #tpu.memory_space<vmem>>, vector<16x32xbf16>,
    } else {
    }
    return
  }
  func.func @transform_0(%arg0: i32, %arg1: i32) -> (i32, i32) {
    %c0_i32 = arith.constant 0 : i32
    return %arg0, %arg1 : i32, i32
  }
  func.func @transform_1(%arg0: i32, %arg1: i32) -> (i32, i32) {
    %c0_i32 = arith.constant 0 : i32
    %c0_i32_0 = arith.constant 0 : i32
    return %arg1, %c0_i32 : i32, i32
  }
  func.func @transform_2(%arg0: i32, %arg1: i32) -> (i32, i32) {
    %c0_i32 = arith.constant 0 : i32
    %c0_i32_0 = arith.constant 0 : i32
    %c0_i32_1 = arith.constant 0 : i32
    return %c0_i32, %c0_i32_0 : i32, i32
  }
  func.func @transform_3(%arg0: i32, %arg1: i32) -> (i32, i32) {
    %c0_i32 = arith.constant 0 : i32
    %c0_i32_0 = arith.constant 0 : i32
    return %arg0, %c0_i32 : i32, i32
  }
  func.func @transform_4(%arg0: i32, %arg1: i32) -> (i32, i32) {
    %c0_i32 = arith.constant 0 : i32
    %c0_i32_0 = arith.constant 0 : i32
    %c0_i32_1 = arith.constant 0 : i32
    return %c0_i32, %c0_i32_0 : i32, i32
  }
  func.func @transform_5(%arg0: i32, %arg1: i32) -> (i32, i32) {
    %c0_i32 = arith.constant 0 : i32
    %c0_i32_0 = arith.constant 0 : i32
    %c0_i32_1 = arith.constant 0 : i32
    return %c0_i32, %c0_i32_0 : i32, i32
  }
  func.func @transform_6(%arg0: i32, %arg1: i32) -> (i32, i32) {
    %c0_i32 = arith.constant 0 : i32
    %c0_i32_0 = arith.constant 0 : i32
    return %arg0, %c0_i32 : i32, i32
  }
}

module attributes {stable_mosaic.version = 11 : i64} {
  func.func @_heads_kernel(%arg0: i32, %arg1: memref<2x32xbf16, #tpu.memory_space<vmem>>, %arg2: memref<32x128xbf16, #tpu.memory_space<vmem>>, %arg3: memref<1x128xf32, #tpu.memory_space<vmem>>, %arg4: memref<2x128xf32, #tpu.memory_space<vmem>>) attributes {dimension_semantics = [#tpu.dimension_semantics<parallel>], iteration_bounds = array<i64: 1>, scalar_prefetch = 0 : i64, scratch_operands = 0 : i64, tpu.core_type = #tpu.core_type<tc>, window_params = [{transform_indices = @transform_0, window_bounds = array<i64: 2, 32>}, {pipeline_mode = #tpu.pipeline_mode<synchronous>, transform_indices = @transform_1, window_bounds = array<i64: 32, 128>}, {pipeline_mode = #tpu.pipeline_mode<synchronous>, transform_indices = @transform_2, window_bounds = array<i64: 1, 128>}, {transform_indices = @transform_3, window_bounds = array<i64: 2, 128>}]} {
    %c0 = arith.constant 0 : index
    %c0_0 = arith.constant 0 : index
    %0 = vector.load %arg1[%c0, %c0_0] : memref<2x32xbf16, #tpu.memory_space<vmem>>, vector<2x32xbf16>
    %c0_1 = arith.constant 0 : index
    %c0_2 = arith.constant 0 : index
    %1 = vector.load %arg2[%c0_1, %c0_2] : memref<32x128xbf16, #tpu.memory_space<vmem>>, vector<32x128xbf16>
    %cst = arith.constant dense<0.000000e+00> : vector<2x128xf32>
    %2 = tpu.matmul %0, %1, %cst {dimension_numbers = #tpu.dot_dimension_numbers<[1], [0], [0], [1], [0, 0, 1, 1], [], []>} : vector<2x32xbf16>, vector<32x128xbf16>, vector<2x128xf32> -> vector<2x128xf32>
    %c0_3 = arith.constant 0 : index
    %c0_4 = arith.constant 0 : index
    %3 = vector.load %arg3[%c0_3, %c0_4] : memref<1x128xf32, #tpu.memory_space<vmem>>, vector<1x128xf32>
    %4 = vector.broadcast %3 : vector<1x128xf32> to vector<2x128xf32>
    %5 = arith.addf %2, %4 : vector<2x128xf32>
    %c0_5 = arith.constant 0 : index
    %c0_6 = arith.constant 0 : index
    %6 = vector.load %arg4[%c0_5, %c0_6] : memref<2x128xf32, #tpu.memory_space<vmem>>, vector<2x128xf32>
    tpu.vector_store %arg4[%c0_5, %c0_6], %5 {strides = array<i32>} : memref<2x128xf32, #tpu.memory_space<vmem>>, vector<2x128xf32>,
    return
  }
  func.func @transform_0(%arg0: i32) -> (i32, i32) {
    %c0_i32 = arith.constant 0 : i32
    %c0_i32_0 = arith.constant 0 : i32
    return %arg0, %c0_i32 : i32, i32
  }
  func.func @transform_1(%arg0: i32) -> (i32, i32) {
    %c0_i32 = arith.constant 0 : i32
    %c0_i32_0 = arith.constant 0 : i32
    %c0_i32_1 = arith.constant 0 : i32
    return %c0_i32, %c0_i32_0 : i32, i32
  }
  func.func @transform_2(%arg0: i32) -> (i32, i32) {
    %c0_i32 = arith.constant 0 : i32
    %c0_i32_0 = arith.constant 0 : i32
    %c0_i32_1 = arith.constant 0 : i32
    return %c0_i32, %c0_i32_0 : i32, i32
  }
  func.func @transform_3(%arg0: i32) -> (i32, i32) {
    %c0_i32 = arith.constant 0 : i32
    %c0_i32_0 = arith.constant 0 : i32
    return %arg0, %c0_i32 : i32, i32
  }
}

</mosaic_0001>

<bundles_post_ra>
// kernel: deberta_multitask_forward.12
= control target key start
LH: loop header
LB: loop body
LE: loop exit
PB: predicated region body
PF: predicated region fallthrough
CT: control target
= control target key end

     0   :  { %vm18_vm0 = vcmask 261120   ;;  %v104_v5 = vmov 32.0   ;;  %vm84_vm6 = vcmask 257024   ;;  %s144_s0 = inlined_call_operand.vmem [shape: bf16[16,32], index: 0, kind: input, shape index: {}]   ;;  %s145_s1 = inlined_call_operand.vmem [shape: f32[1,32], index: 1, kind: input, shape index: {}]   ;;  %s146_s2 = inlined_call_operand.vmem [shape: f32[1,32], index: 2, kind: input, shape index: {}]   ;;  %s147_s3 = inlined_call_operand.vmem [shape: bf16[16,32], index: 3, kind: output, shape index: {}]  }
   0x1   :  { %v92_v0 = vld [vmem:[%s144_s0] sm:$0xff]   ;;  %98 = vrcp.f32 %v104_v5 }
   0x2   :  { %v93_v1 = vunpack.c.l.bf16 %v92_v0  ;;  %v94_v3 = vunpack.c.h.bf16 %v92_v0  ;;  %v96_v36 = vld [vmem:[%s145_s1] ss:$0 sm:$0xff] }
   0x3   :  { %v97_v39 = vld [vmem:[%s146_s2] ss:$0 sm:$0xff] }
   0x4   :  { %v19_v2 = vsel %vm18_vm0, %v93_v1, 0.0  ;;  %v22_v4 = vsel %vm18_vm0, %v94_v3, 0.0 }
   0x5   :  { %20 = vadd.xlane.f32.xlu0 %v19_v2 }
   0x7   :  { %v99_v6 = vpop.eup %98 }
   0x8   :  { %v26_v7 = vmul.f32 32.0, %v99_v6  ;;  %vm30_vm1 = vweird.f32 %v99_v6 }
   0xa   :  { %v27_v8 = vsub.f32 1.0, %v26_v7 }
   0xc   :  { %v28_v9 = vmul.f32 %v99_v6, %v27_v8 }
   0xd   :  { %23 = vadd.xlane.f32.xlu0 %v22_v4 }
   0xe   :  { %v29_v10 = vadd.f32 %v99_v6, %v28_v9 }
  0x10   :  { %v31_v11 = vsel %vm30_vm1, %v99_v6, %v29_v10 }
  0x78   :  { %v21_v12 = vpop.xlane.xlu0 %20 }
  0x79   :  { %v32_v13 = vmul.f32 %v31_v11, %v21_v12 }
  0x7b   :  { %v34_v14 = vsub.f32 %v93_v1, %v32_v13 }
  0x7d   :  { %v36_v15 = vmul.f32 %v34_v14, %v34_v14 }
  0x7f   :  { %v38_v16 = vsel %vm18_vm0, %v36_v15, 0.0 }
  0x80   :  { %39 = vadd.xlane.f32.xlu1 %v38_v16  ;;  %v24_v17 = vpop.xlane.xlu0 %23 }
  0x81   :  { %v33_v18 = vmul.f32 %v31_v11, %v24_v17 }
  0x83   :  { %v35_v19 = vsub.f32 %v94_v3, %v33_v18 }
  0x85   :  { %v37_v20 = vmul.f32 %v35_v19, %v35_v19 }
  0x87   :  { %v41_v21 = vsel %vm18_vm0, %v37_v20, 0.0 }
  0x88   :  { %42 = vadd.xlane.f32.xlu1 %v41_v21 }
  0xf3   :  { %v40_v22 = vpop.xlane.xlu1 %39 }
  0xf4   :  { %v44_v23 = vmul.f32 %v40_v22, %v31_v11 }
  0xf6   :  { %v46_v24 = vadd.f32 1e-07, %v44_v23 }
  0xf8   :  { %100 = vrsqrt.f32 %v46_v24  ;;  %vm54_vm3 = vweird.f32 %v46_v24 }
  0xfb   :  { %v43_v25 = vpop.xlane.xlu1 %42 }
  0xfc   :  { %v45_v26 = vmul.f32 %v43_v25, %v31_v11 }
  0xfe   :  { %v101_v27 = vpop.eup %100  ;;  %v47_v28 = vadd.f32 1e-07, %v45_v26 }
  0xff   :  { %v49_v29 = vmul.f32 %v101_v27, %v46_v24  ;;  %vm55_vm2 = vweird.f32 %v101_v27 }
 0x100   :  { %102 = vrsqrt.f32 %v47_v28  ;;  %vm56_vm4 = vmor %vm54_vm3, %vm55_vm2  ;;  %vm64_vm7 = vweird.f32 %v47_v28 }
 0x101   :  { %v50_v30 = vmul.f32 %v101_v27, %v49_v29 }
 0x103   :  { %v51_v31 = vmul.f32 0.5, %v50_v30 }
 0x105   :  { %v52_v32 = vsub.f32 1.5, %v51_v31 }
 0x106   :  { %v103_v33 = vpop.eup %102 }
 0x107   :  { %v53_v34 = vmul.f32 %v101_v27, %v52_v32  ;;  %v59_v35 = vmul.f32 %v103_v33, %v47_v28  ;;  %vm65_vm5 = vweird.f32 %v103_v33 }
 0x108   :  { %vm66_vm8 = vmor %vm64_vm7, %vm65_vm5 }
 0x109   :  { %v57_v37 = vsel %vm56_vm4, %v101_v27, %v53_v34  ;;  %v60_v38 = vmul.f32 %v103_v33, %v59_v35 }
 0x10a   :  { %v68_v40 = vmul.f32 %v57_v37, %v34_v14 }
 0x10b   :  { %v61_v41 = vmul.f32 0.5, %v60_v38 }
 0x10c   :  { %v74_v42 = vmul.f32 %v96_v36, %v68_v40 }
 0x10d   :  { %v62_v43 = vsub.f32 1.5, %v61_v41 }
 0x10e   :  { %v80_v44 = vadd.f32 %v97_v39, %v74_v42 }
 0x10f   :  { %v63_v45 = vmul.f32 %v103_v33, %v62_v43 }
 0x110   :  { %v82_v46 = vpack.c.bf16 %v80_v44, %v80_v44 }
 0x111   :  { %v67_v47 = vsel %vm66_vm8, %v103_v33, %v63_v45 }
 0x112   :  { %85 = vst.msk [vmem:[%s147_s3] sm:$0xf] %vm84_vm6, %v82_v46  ;;  %v69_v48 = vmul.f32 %v67_v47, %v35_v19 }
 0x114   :  { %v75_v49 = vmul.f32 %v96_v36, %v69_v48 }
 0x116   :  { %v81_v50 = vadd.f32 %v97_v39, %v75_v49 }
 0x118   :  { %v83_v51 = vpack.c.bf16 %v81_v50, %v81_v50 }
 0x11a   :  { %86 = vst.msk [vmem:[%s147_s3 + $0x4] sm:$0xf] %vm84_vm6, %v83_v51 }

// kernel: deberta_multitask_forward.14
= control target key start
LH: loop header
LB: loop body
LE: loop exit
PB: predicated region body
PF: predicated region fallthrough
CT: control target
= control target key end

     0   :  { %s791_s15 = smov 0   ;;  %s793_s16 = smov 0   ;;  %s877_s0 = inlined_call_operand.vmem [shape: bf16[12,2,8,8], index: 0, kind: input, shape index: {}, may-alias: {0,1,2}]   ;;  %s878_s1 = inlined_call_operand.vmem [shape: bf16[12,2,8,8], index: 1, kind: input, shape index: {}, may-alias: {0,1,2}]   ;;  %s879_s2 = inlined_call_operand.vmem [shape: bf16[12,2,8,8], index: 2, kind: input, shape index: {}, may-alias: {0,1,2}]   ;;  %s880_s3 = inlined_call_operand.vmem [shape: f32[2,1,8], index: 3, kind: input, shape index: {}]   ;;  %s881_s4 = inlined_call_operand.vmem [shape: bf16[4,2,8,8], index: 4, kind: output, shape index: {}]  }
   0x1   :  { %s795_s17 = smov 0   ;;  %s797_s18 = smov 0  }
   0x2   :  { %s799_s19 = smov 0  }
   0x3 LB: > { %s36_s20 = sadd.s32 1, %s753_s17  ;;  %s40_s21 = sadd.s32 1, %s757_s18  ;;  %s761_s19 = sphi %s799_s19, %s14_s19   ;;  %s757_s18 = sphi %s797_s18, %s885_s18   ;;  %s753_s17 = sphi %s795_s17, %s884_s17   ;;  %s749_s16 = sphi %s793_s16, %s883_s16   ;;  %s745_s15 = sphi %s791_s15, %s882_s15  }
   0x4   : > { %p38_p0 = scmp.ge.s32.totalorder %s36_s20, 2  ;;  %p657_p1 = scmp.ge.s32.totalorder %s761_s19, 1 }
   0x5   : > { %p263_p2 = scmp.lt.s32.totalorder %s761_s19, 9 }
   0x6   : > { %s887_s20 = smov (%p38_p0, %s36_s20), 0  ;;  %s889_s21 = smov (!%p38_p0, %s40_s21), %s757_s18 }
   0x7   : > { %p264_p3 = pnand %p657_p1, %p263_p2  ;;  %p42_p4 = scmp.ge.s32.totalorder %s889_s21, 4 }
   0x8   : > { %p333_p5 = scmp.lt.s32.totalorder (!%p264_p3), %s745_s15, 1  ;;  %s342_s22 = sadd.s32 (!%p264_p3), 4, %s749_s16 }
   0x9   : > { %s891_s21 = smov (%p42_p4, %s889_s21), 0  ;;  %267 = sbr.rel (%p264_p3) target bundleno = 634 (0x27a), region = 36 }
   0xa   : > { %p343_p6 = scmp.lt.s32.totalorder (!%p264_p3), %s342_s22, 11  ;;  %p331_p7 = scmp.lt.s32.totalorder (!%p264_p3), %s749_s16, 11 }
   0xb   : > { %s355_s13 = sadd.s32 (!%p264_p3), 8, %s749_s16  ;;  %p374_p9 = scmp.lt.s32.totalorder (!%p264_p3), %s749_s16, 3 }
   0xc   : > { %p356_p8 = scmp.lt.s32.totalorder (!%p264_p3), %s355_s13, 11 }
   0xe   : > { %s893_s15 = smov (!%p333_p5, %s745_s15), 1  ;;  %s895_s22 = smov (!%p343_p6, %s342_s22), 11  ;;  %vm393_vm0 = vcmask 64512   ;;  %vm390_vm1 = vcmask 7168   ;;  %v763_v3 = vmov -inf   ;;  %v764_v10 = vmov 0  }
   0xf   : > { %s332_s23 = scalar_select %p331_p7, %s749_s16, 11  ;;  %391 = vst.msk [vmem:[#allocation2] sm:$0xff] %vm390_vm1, %v763_v3  ;;  %713 = vset.pattern.permute.xlu0 %v764_v10  ;;  %714 = vset.pattern.permute.xlu1 %v764_v10  ;;  %v765_v11 = vmov 0.0   ;;  %vm459_vm2 = vcmask 1043456   ;;  %vm492_vm3 = vcmask 60416  }
  0x10   : > { %s660_s24 = sshll.u32 %s895_s22, 1  ;;  %s373_s12 = scalar_lea.vmem %s880_s3, %s893_s15  ;;  %715 = vset.pattern.permute.xlu2 %v764_v10  ;;  %392 = vst.msk [vmem:[#allocation3] sm:$0xff] %vm390_vm1, %v765_v11 }
  0x11   : > { %s351_s25 = sadd.s32 %s660_s24, %s893_s15  ;;  %s658_s26 = sshll.u32 %s332_s23, 1  ;;  %v716_v4 = vld [vmem:[%s373_s12] ss:$0 sm:$0xff]  ;;  %394 = vst.msk [vmem:[#allocation4] sm:$0xff] %vm393_vm0, %v765_v11 }
  0x12   : > { %s661_s27 = sshll.u32 %s351_s25, 2  ;;  %s339_s28 = sadd.s32 %s658_s26, %s893_s15 }
  0x13   : > { %s353_s5 = scalar_lea.vmem %s878_s1, %s661_s27  ;;  %s659_s6 = sshll.u32 %s339_s28, 2 }
  0x14   : > { %v396_v0 = vld [vmem:[%s353_s5] sm:$0xf]  ;;  %s341_s9 = scalar_lea.vmem %s877_s0, %s659_s6  ;;  %s897_s13 = smov (!%p356_p8, %s355_s13), 11 }
  0x15   : > { %v402_v1 = vsel %vm393_vm0, %v396_v0, 0  ;;  %v395_v2 = vld [vmem:[%s341_s9] sm:$0xf]  ;;  %s662_s14 = sshll.u32 %s897_s13, 1  ;;  %s899_s16 = smov (!%p374_p9, %s749_s16), 3 }
  0x16   : > { %411 = vmatpush.bf16.xpose.msra.mxu0 %v402_v1  ;;  %v423_v12 = vld [vmem:[#allocation2] sm:$0xff]  ;;  %s364_s22 = sadd.s32 %s662_s14, %s893_s15  ;;  %s664_s27 = sshll.u32 %s899_s16, 1 }
  0x17   : > { %s663_s23 = sshll.u32 %s364_s22, 2  ;;  %v439_v26 = vld [vmem:[#allocation3] sm:$0xff]  ;;  %s382_s28 = sadd.s32 %s664_s27, %s893_s15 }
  0x18   : > { %s366_s26 = scalar_lea.vmem %s879_s2, %s663_s23  ;;  %v447_v34 = vld [vmem:[#allocation4] sm:$0xff]  ;;  %s665_s29 = sshll.u32 %s382_s28, 2 }
  0x19   : > { %v455_v16 = vld [vmem:[%s366_s26] sm:$0xf]  ;;  %s384_s6 = scalar_lea.vmem %s881_s4, %s665_s29 }
  0x1a   : > { %v461_v17 = vsel %vm459_vm2, %v455_v16, 0 }
  0x1b   : > { %470 = vmatpush.bf16.msra.mxu1 %v461_v17 }
  0x1d   : > { %666 = vmatmul.msk.bf16.vlgmr.msra.gmra.mxu0 %vm393_vm0, %v395_v2 }
  0x9a   : > { %v413_v5 = vpop.f32.mrf.mxu0 }
  0x9b   : > { %v417_v6 = vmul.f32 0.35355338, %v413_v5 }
  0x9d   : > { %v422_v7 = vadd.f32 %v716_v4, %v417_v6 }
  0x9f   : > { %v424_v8 = vsel %vm393_vm0, %v422_v7, -inf }
  0xa0   : > { %425 = vmax.xlane.f32.xlu0 %v424_v8 }
  0xa2   : > { %v415_v9 = vpop.f32.mrf.mxu0 }
 0x113   : > { %v426_v13 = vpop.xlane.xlu0 %425 }
 0x114   : > { %v427_v14 = vmax.f32 %v423_v12, %v426_v13 }
 0x116   : > { %v428_v15 = vsub.f32 %v423_v12, %v427_v14  ;;  %478 = vst.msk [vmem:[#allocation2] sm:$0xff] %vm390_vm1, %v427_v14  ;;  %433 = vperm.xlu0 %713, %v427_v14  }
 0x118   : > { %v429_v24 = vmul.f32 1.442695, %v428_v15 }
 0x188   : > { %v434_v18 = vpop.permute.xlu0 %433 }
 0x189   : > { %v436_v19 = vsub.f32 %v422_v7, %v434_v18 }
 0x18b   : > { %v437_v20 = vmul.f32 1.442695, %v436_v19 }
 0x18d   : > { %717 = vpow2.f32 %v437_v20 }
 0x18e   : > { %719 = vpow2.f32 %v429_v24 }
 0x193   : > { %v718_v21 = vpop.eup %717 }
 0x194   : > { %v441_v22 = vsel %vm393_vm0, %v718_v21, 0.0  ;;  %v454_v23 = vpack.c.bf16 %v718_v21, %v718_v21  ;;  %v720_v25 = vpop.eup %719 }
 0x195   : > { %442 = vadd.xlane.f32.xlu1 %v441_v22  ;;  %v440_v27 = vmul.f32 %v720_v25, %v439_v26 }
 0x196   : > { %667 = vmatmul.msk.bf16.vlgmr.msra.gmra.mxu1 %vm393_vm0, %v454_v23 }
 0x1ae   : > { %450 = vperm.xlu1 %714, %v720_v25  }
 0x208   : > { %v443_v28 = vpop.xlane.xlu1 %442 }
 0x209   : > { %v444_v29 = vadd.f32 %v443_v28, %v440_v27 }
 0x20b   : > { %446 = vst.msk [vmem:[#allocation3] sm:$0xff] %vm390_vm1, %v444_v29 }
 0x212   : > { %v483_v30 = vld [vmem:[#allocation3] sm:$0xff] }
 0x213   : > { %v472_v31 = vpop.f32.mrf.mxu1  ;;  %721 = vrcp.f32 %v483_v30 }
 0x219   : > { %v722_v32 = vpop.eup %721 }
 0x21a   : > { %487 = vperm.xlu2 %715, %v722_v32  }
 0x21b   : > { %v474_v33 = vpop.f32.mrf.mxu1 }
 0x220   : > { %v451_v35 = vpop.permute.xlu1 %450 }
 0x221   : > { %v453_v36 = vmul.f32 %v451_v35, %v447_v34 }
 0x223   : > { %v476_v37 = vadd.f32 %v472_v31, %v453_v36 }
 0x225   : > { %477 = vst.msk [vmem:[#allocation4] sm:$0xff] %vm393_vm0, %v476_v37 }
 0x22c   : > { %v482_v38 = vld [vmem:[#allocation4] sm:$0xff] }
 0x274   : > { %v488_v39 = vpop.permute.xlu2 %487 }
 0x275   : > { %v490_v40 = vmul.f32 %v488_v39, %v482_v38 }
 0x277   : > { %v491_v41 = vpack.c.bf16 %v490_v40, %v490_v40 }
 0x279   : > { %493 = vst.msk [vmem:[%s384_s6] sm:$0xf] %vm492_vm3, %v491_v41 }
 0x27a PF: > { %s14_s19 = sadd.s32 1, %s761_s19   ;;  %s882_s15 = smov %s753_s17 }
 0x27b   : > { %p11_p10 = scmp.ge.s32.totalorder %s14_s19, 10   ;;  %s883_s16 = smov %s757_s18 }
 0x27c   : > { %s884_s17 = smov %s887_s20  ;;  %s885_s18 = smov %s891_s21 }
 0x27d   :  { %13 = sbr.rel (!%p11_p10) target bundleno = 3 (0x3), region = 83 }

// kernel: deberta_multitask_forward.15
= control target key start
LH: loop header
LB: loop body
LE: loop exit
PB: predicated region body
PF: predicated region fallthrough
CT: control target
= control target key end

     0   :  { %s687_s21 = smov 0   ;;  %s689_s22 = smov 0   ;;  %s765_s0 = inlined_call_operand.vmem [shape: bf16[4,2,8,8], index: 0, kind: input, shape index: {}]   ;;  %s766_s1 = inlined_call_operand.vmem [shape: bf16[4,8,32], index: 1, kind: input, shape index: {}]   ;;  %s767_s2 = inlined_call_operand.vmem [shape: f32[1,32], index: 2, kind: input, shape index: {}, may-alias: {2,5}]   ;;  %s768_s3 = inlined_call_operand.vmem [shape: bf16[2,8,32], index: 3, kind: input, shape index: {}]   ;;  %s769_s4 = inlined_call_operand.vmem [shape: f32[1,32], index: 4, kind: input, shape index: {}]   ;;  %s770_s5 = inlined_call_operand.vmem [shape: f32[1,32], index: 5, kind: input, shape index: {}, may-alias: {2,5}]   ;;  %s771_s6 = inlined_call_operand.vmem [shape: bf16[2,8,32], index: 6, kind: output, shape index: {}]  }
   0x1   :  { %s691_s23 = smov 0   ;;  %s693_s24 = smov 0  }
   0x2   :  { %s695_s25 = smov 0  }
   0x3 LB: > { %s28_s26 = sadd.s32 1, %s640_s23  ;;  %s35_s27 = sadd.s32 1, %s644_s24  ;;  %s648_s25 = sphi %s695_s25, %s16_s25   ;;  %s644_s24 = sphi %s693_s24, %s777_s24   ;;  %s640_s23 = sphi %s691_s23, %s776_s23   ;;  %s636_s22 = sphi %s689_s22, %s775_s22   ;;  %s632_s21 = sphi %s687_s21, %s774_s21  }
   0x4   : > { %p29_p0 = scmp.ge.s32.totalorder %s28_s26, 4  ;;  %p550_p1 = scmp.ge.s32.totalorder %s648_s25, 1 }
   0x5   : > { %p266_p2 = scmp.lt.s32.totalorder %s648_s25, 9 }
   0x6   : > { %s779_s26 = smov (%p29_p0, %s28_s26), 0  ;;  %s781_s27 = smov (!%p29_p0, %s35_s27), %s644_s24 }
   0x7   : > { %p267_p3 = pnand %p550_p1, %p266_p2  ;;  %p37_p4 = scmp.ge.s32.totalorder %s781_s27, 2 }
   0x8   : > { %p315_p5 = scmp.lt.s32.totalorder (!%p267_p3), %s632_s21, 3  ;;  %p317_p6 = scmp.lt.s32.totalorder (!%p267_p3), %s636_s22, 1 }
   0x9   : > { %s783_s27 = smov (%p37_p4, %s781_s27), 0  ;;  %270 = sbr.rel (%p267_p3) target bundleno = 444 (0x1bc), region = 44 }
   0xa   : > { %772 = sst [smem:[#allocation3_spill]] %s783_s27  ;;  %p556_p7 = scmp.ne.s32.totalorder (!%p267_p3), %s632_s21, 0 }
   0xe   : > { %s316_s28 = scalar_select %p315_p5, %s632_s21, 3 }
   0xf   : > { %s785_s22 = smov (!%p317_p6, %s636_s22), 1 }
  0x10   : > { %s551_s29 = sshll.u32 %s316_s28, 1  ;;  %s553_s30 = sshll.u32 %s316_s28, 2 }
  0x11   : > { %s323_s7 = sadd.s32 %s551_s29, %s785_s22  ;;  %s329_s10 = scalar_lea.vmem %s766_s1, %s553_s30 }
  0x12   : > { %s552_s11 = sshll.u32 %s323_s7, 2  ;;  %s554_s12 = sshll.u32 %s785_s22, 2 }
  0x13   : > { %s325_s15 = scalar_lea.vmem %s765_s0, %s552_s11  ;;  %s336_s18 = scalar_lea.vmem %s768_s3, %s554_s12 }
  0x14   : > { %s733_s27 = scalar_lea.vmem %s771_s6, %s554_s12  ;;  %348 = sbr.rel (%p556_p7) target bundleno = 27 (0x1b), region = 48 }
  0x19   : > { %vm349_vm0 = vcmask 261120   ;;  %v650_v0 = vmov 0.0  }
  0x1a   : > { %350 = vst.msk [vmem:[#allocation2] sm:$0xff] %vm349_vm0, %v650_v0 }
  0x1b PF: > { %v353_v1 = vld [vmem:[%s329_s10] sm:$0xf]  ;;  %vm358_vm1 = vcmask 1043456   ;;  %vm354_vm2 = vcmask 64512   ;;  %vm376_vm3 = vcmask 261120   ;;  %p558_p8 = scmp.ne.s32.totalorder %s632_s21, 3 }
  0x1c   : > { %v360_v2 = vsel %vm358_vm1, %v353_v1, 0  ;;  %v352_v3 = vld [vmem:[%s325_s15] sm:$0xf] }
  0x1d   : > { %369 = vmatpush.bf16.msra.mxu0 %v360_v2 }
  0x20   : > { %557 = vmatmul.msk.bf16.vlgmr.msra.gmra.mxu0 %vm354_vm2, %v352_v3 }
  0x21   : > { %v351_v4 = vld [vmem:[#allocation2] sm:$0xff] }
  0x9d   : > { %v371_v5 = vpop.f32.mrf.mxu0 }
  0x9e   : > { %v375_v6 = vadd.f32 %v371_v5, %v351_v4 }
  0xa0   : > { %377 = vst.msk [vmem:[#allocation2] sm:$0xff] %vm376_vm3, %v375_v6 }
  0xa1   : > { %381 = sbr.rel (%p558_p8) target bundleno = 444 (0x1bc), region = 52 }
  0xa5   : > { %v373_v7 = vpop.f32.mrf.mxu0 }
  0xa6   : > { %v603_v9 = vld [vmem:[%s767_s2] ss:$0 sm:$0xff]  ;;  %v651_v15 = vmov 32.0   ;;  %vm431_vm8 = vcmask 257024  }
  0xa7   : > { %v382_v8 = vld [vmem:[#allocation2] sm:$0xff]  ;;  %606 = vrcp.f32 %v651_v15 }
  0xa8   : > { %v388_v10 = vld [vmem:[%s336_s18] sm:$0xf]  ;;  %v387_v11 = vadd.f32 %v603_v9, %v382_v8 }
  0xa9   : > { %v389_v12 = vunpack.c.l.bf16 %v388_v10  ;;  %v604_v36 = vld [vmem:[%s769_s4] ss:$0 sm:$0xff] }
  0xaa   : > { %v605_v38 = vld [vmem:[%s770_s5] ss:$0 sm:$0xff] }
  0xab   : > { %v390_v13 = vadd.f32 %v389_v12, %v387_v11 }
  0xad   : > { %v391_v14 = vsel %vm376_vm3, %v390_v13, 0.0  ;;  %v607_v16 = vpop.eup %606 }
  0xae   : > { %392 = vadd.xlane.f32.xlu0 %v391_v14  ;;  %v395_v17 = vmul.f32 32.0, %v607_v16  ;;  %vm399_vm4 = vweird.f32 %v607_v16 }
  0xb0   : > { %v396_v18 = vsub.f32 1.0, %v395_v17 }
  0xb2   : > { %v397_v19 = vmul.f32 %v607_v16, %v396_v18 }
  0xb4   : > { %v398_v20 = vadd.f32 %v607_v16, %v397_v19 }
  0xb6   : > { %v400_v21 = vsel %vm399_vm4, %v607_v16, %v398_v20 }
 0x121   : > { %v393_v22 = vpop.xlane.xlu0 %392 }
 0x122   : > { %v401_v23 = vmul.f32 %v400_v21, %v393_v22 }
 0x124   : > { %v402_v24 = vsub.f32 %v390_v13, %v401_v23 }
 0x126   : > { %v403_v25 = vmul.f32 %v402_v24, %v402_v24 }
 0x128   : > { %v404_v26 = vsel %vm376_vm3, %v403_v25, 0.0 }
 0x129   : > { %405 = vadd.xlane.f32.xlu0 %v404_v26 }
 0x19c   : > { %v406_v27 = vpop.xlane.xlu0 %405 }
 0x19d   : > { %v407_v28 = vmul.f32 %v406_v27, %v400_v21 }
 0x19f   : > { %v408_v29 = vadd.f32 1e-07, %v407_v28 }
 0x1a1   : > { %608 = vrsqrt.f32 %v408_v29  ;;  %vm415_vm6 = vweird.f32 %v408_v29 }
 0x1a7   : > { %v609_v30 = vpop.eup %608 }
 0x1a8   : > { %v410_v31 = vmul.f32 %v609_v30, %v408_v29  ;;  %vm416_vm5 = vweird.f32 %v609_v30 }
 0x1a9   : > { %vm417_vm7 = vmor %vm415_vm6, %vm416_vm5 }
 0x1aa   : > { %v411_v32 = vmul.f32 %v609_v30, %v410_v31 }
 0x1ac   : > { %v412_v33 = vmul.f32 0.5, %v411_v32 }
 0x1ae   : > { %v413_v34 = vsub.f32 1.5, %v412_v33 }
 0x1b0   : > { %v414_v35 = vmul.f32 %v609_v30, %v413_v34 }
 0x1b2   : > { %v418_v37 = vsel %vm417_vm7, %v609_v30, %v414_v35 }
 0x1b3   : > { %v419_v39 = vmul.f32 %v418_v37, %v402_v24 }
 0x1b5   : > { %v424_v40 = vmul.f32 %v604_v36, %v419_v39 }
 0x1b7   : > { %v429_v41 = vadd.f32 %v605_v38, %v424_v40 }
 0x1b9   : > { %v430_v42 = vpack.c.bf16 %v429_v41, %v429_v41 }
 0x1bb   : > { %432 = vst.msk [vmem:[%s733_s27] sm:$0xf] %vm431_vm8, %v430_v42 }
 0x1bc PF: > { %s16_s25 = sadd.s32 1, %s648_s25   ;;  %s773_s8 = sld [smem:[#allocation3_spill]] }
 0x1bd   : > { %p13_p9 = scmp.ge.s32.totalorder %s16_s25, 10   ;;  %s774_s21 = smov %s640_s23 }
 0x1be   : > { %s775_s22 = smov %s644_s24  ;;  %s776_s23 = smov %s779_s26 }
 0x1bf   :  { %15 = sbr.rel (!%p13_p9) target bundleno = 3 (0x3), region = 88 }
 0x1c2   : > { %s777_s24 = smov %s773_s8 }

// kernel: deberta_multitask_forward.13
= control target key start
LH: loop header
LB: loop body
LE: loop exit
PB: predicated region body
PF: predicated region fallthrough
CT: control target
= control target key end

     0   :  { %8 = vsyncpa [#allocation4], 0  ;;  %s1134_s0 = inlined_call_operand.vmem [shape: bf16[2,8,32], index: 0, kind: input, shape index: {}]   ;;  %s1135_s1 = inlined_call_operand.hbm [shape: bf16[12,32,8], index: 1, kind: input, shape index: {}]   ;;  %s1136_s2 = inlined_call_operand.vmem [shape: f32[12,1,8], index: 2, kind: input, shape index: {}]   ;;  %s1137_s3 = inlined_call_operand.vmem [shape: bf16[12,2,8,8], index: 3, kind: output, shape index: {}]  }
   0x1   :  { %10 = vsyncpa [#allocation4 + $0x1], 0  ;;  %s968_s12 = smov 0   ;;  %s970_s13 = smov 0  }
   0x2   :  { %s972_s14 = smov 0   ;;  %s974_s15 = smov 0  }
   0x3   :  { %s976_s16 = smov 0   ;;  %s978_s17 = smov 0  }
   0x4   :  { %s980_s18 = smov 0   ;;  %s982_s19 = smov 0  }
   0x5   :  { %s984_s20 = smov 0   ;;  %s986_s21 = smov 0  }
   0x6 LB: > { %s653_s22 = sadd.s32 4294967295, %s943_s21   ;;  %s38_s23 = sadd.s32 1, %s935_s19  ;;  %s943_s21 = sphi %s986_s21, %s16_s21   ;;  %s939_s20 = sphi %s984_s20, %s1155_s20   ;;  %s935_s19 = sphi %s982_s19, %s1154_s19   ;;  %s931_s18 = sphi %s980_s18, %s1153_s18   ;;  %s927_s17 = sphi %s978_s17, %s1152_s17   ;;  %s923_s16 = sphi %s976_s16, %s1151_s16   ;;  %s919_s15 = sphi %s974_s15, %s1150_s15   ;;  %s915_s14 = sphi %s972_s14, %s1149_s14   ;;  %s911_s13 = sphi %s970_s13, %s1148_s13   ;;  %s907_s12 = sphi %s968_s12, %s1147_s12  }
   0x7   : > { %p40_p0 = scmp.ge.s32.totalorder %s38_s23, 2  ;;  %s42_s24 = sadd.s32 1, %s939_s20 }
   0x8   : > { %s81_s25 = sadd.s32 1, %s923_s16  ;;  %p88_p1 = scmp.ne.s32.totalorder %s923_s16, %s919_s15 }
   0x9   : > { %s1157_s23 = smov (%p40_p0, %s38_s23), 0  ;;  %s1159_s24 = smov (!%p40_p0, %s42_s24), %s939_s20 }
   0xa   : > { %1140 = sst [smem:[#allocation7_spill]] %s1157_s23  ;;  %p89_p2 = scmp.eq.s32.totalorder %s943_s21, 0 }
   0xb   : > { %p94_p3 = scmp.ne.s32.totalorder %s919_s15, %s915_s14  ;;  %p44_p4 = scmp.ge.s32.totalorder %s1159_s24, 3 }
   0xc   : > { %p95_p5 = scmp.eq.s32.totalorder %s653_s22, 0  ;;  %p1027_p6 = por %p89_p2, %p88_p1 }
   0xd   : > { %s131_s27 = ssub.s32 %s935_s19, %s1157_s23  ;;  %s1161_s24 = smov (%p44_p4, %s1159_s24), 0 }
   0xe   : > { %1142 = sst [smem:[#allocation8_spill]] %s1161_s24  ;;  %p1035_p7 = por %p95_p5, %p94_p3 }
   0xf   : > { %s137_s29 = sadd.s32 1, %s911_s13  ;;  %s76_s30 = ssub.s32 %s939_s20, %s1161_s24 }
  0x10   : > { %p147_p8 = scmp.ne.s32.totalorder %s911_s13, %s907_s12  ;;  %p79_p9 = scmp.eq.s32.totalorder %s76_s30, 0 }
  0x11   : > { %s132_s4 = sor.u32 %s131_s27, %s76_s30  ;;  %p148_p11 = scmp.eq.s32.totalorder %s653_s22, 5 }
  0x12   : > { %p135_p10 = scmp.eq.s32.totalorder %s132_s4, 0  ;;  %p743_p13 = scmp.lt.s32.totalorder %s943_s21, 6 }
  0x13   : > { %s1045_s5 = scalar_select %p79_p9, %s923_s16, %s81_s25  }
  0x14   : > { %s1048_s6 = scalar_select %p135_p10, %s911_s13, %s137_s29  }
  0x15   : > { %p1050_p12 = por %p148_p11, %p147_p8  ;;  %s187_s8 = sand.u32 1, %s923_s16  }
  0x16   : > { %s657_s9 = sshll.u32 %s187_s8, 6  ;;  %s727_s10 = sshll.u32 %s939_s20, 6 }
  0x17   : > { %s199_s27 = scalar_lea.hbm %s1135_s1, %s727_s10  ;;  %s191_s30 = scalar_lea.vmem [#allocation3], %s657_s9 }
  0x18   : > { %s202_s4 = sshll.u32 %s191_s30, 4  ;;  %s200_s22 = sshll.u32 %s199_s27, 4  ;;  %s203_s4 = int_to_ptr.vmem [resolvable:$true] %s202_s4  ;;  %s201_s22 = int_to_ptr.hbm [resolvable:$true] %s200_s22 }
  0x19   : > { %p740_p0 = pnand %p743_p13, %p1027_p6  ;;  %p661_p1 = scmp.ge.s32.totalorder %s943_s21, 1 }
  0x1a   : > { %s188_s25 = scalar_lea.sflag [#allocation4], %s187_s8  ;;  %s945_s29 = smov 64  }
  0x1b   : > { %s946_s24 = smov 4   ;;  %p218_p2 = scmp.lt.s32.totalorder %s943_s21, 7 }
  0x1c   : > { %742 = dma.hbm_to_vmem [thread:$0]  (!%p740_p0), %s201_s22, 1024, %s203_s4, %s188_s25, %s945_s29, %s945_s29, %s946_s24  }
  0x1d   : > { %p219_p3 = pnand %p661_p1, %p218_p2 }
  0x1e   : > { %s224_s23 = sand.u32 (!%p219_p3), 1, %s919_s15  }
  0x1f   : > { %222 = sbr.rel (%p219_p3) target bundleno = 202 (0xca), region = 32  ;;  %s662_s11 = sshll.u32 (!%p219_p3), %s224_s23, 6 }
  0x20   : > { %s225_s10 = scalar_lea.sflag (!%p219_p3), [#allocation4], %s224_s23  ;;  %s228_s9 = scalar_lea.vmem (!%p219_p3), [#allocation3], %s662_s11 }
  0x24   : > { %902 = dma.done.wait (%p1035_p7), %s225_s10, 1024  }
  0x25   : > { %904 = vsyncadd (%p1035_p7), %s225_s10, 4294966272  ;;  %p265_p4 = scmp.lt.s32.totalorder %s927_s17, 1  ;;  %vm288_vm0 = vcmask 64512   ;;  %s665_s24 = sshll.u32 %s931_s18, 2  ;;  %v947_v0 = vmov 0.0   ;;  %v729_v1 = vld [vmem:[%s228_s9 + $0x8] sm:$0xff] }
  0x26   : > { %289 = vst.msk [vmem:[#allocation2] sm:$0xff] %vm288_vm0, %v947_v0  ;;  %p278_p5 = scmp.lt.s32.totalorder %s665_s24, 11  ;;  %v731_v2 = vld [vmem:[%s228_s9 + $0x18] sm:$0xff]  ;;  %v733_v3 = vld [vmem:[%s228_s9 + $0x28] sm:$0xff]  ;;  %321 = vmatpush.bf16.msra.mxu0 %v729_v1  ;;  %v728_v5 = vld [vmem:[%s228_s9] sm:$0xff]  ;;  %vm311_vm1 = vcmask 261120  }
  0x27   : > { %s266_s26 = scalar_select %p265_p4, %s927_s17, 1  ;;  %290 = vst.msk [vmem:[#allocation2 + $0x8] sm:$0xff] %vm288_vm0, %v947_v0  ;;  %v735_v4 = vld [vmem:[%s228_s9 + $0x38] sm:$0xff]  ;;  %356 = vmatpush.bf16.msra.mxu1 %v731_v2  ;;  %v730_v6 = vld [vmem:[%s228_s9 + $0x10] sm:$0xff]  ;;  %v732_v7 = vld [vmem:[%s228_s9 + $0x20] sm:$0xff]  ;;  %390 = vmatpush.bf16.msra.mxu2 %v733_v3  ;;  %vm443_vm2 = vcmask 60416  }
  0x28   : > { %291 = vst.msk [vmem:[#allocation2 + $0x10] sm:$0xff] %vm288_vm0, %v947_v0  ;;  %s1163_s24 = smov (!%p278_p5, %s665_s24), 11  ;;  %424 = vmatpush.bf16.msra.mxu3 %v735_v4  ;;  %v734_v8 = vld [vmem:[%s228_s9 + $0x30] sm:$0xff]  ;;  %s262_s22 = sand.u32 1, %s907_s12  }
  0x29   : > { %292 = vst.msk [vmem:[#allocation2 + $0x18] sm:$0xff] %vm288_vm0, %v947_v0  ;;  %s664_s23 = sshll.u32 %s266_s26, 2  ;;  %s1079_s14 = scalar_lea.vmem %s1136_s2, %s1163_s24 }
  0x2a   : > { %s274_s4 = scalar_lea.vmem %s1134_s0, %s664_s23  ;;  %322 = vmatpush.bf16.msra.mxu0 %v728_v5  ;;  %v827_v18 = vld [vmem:[%s1079_s14] ss:$0 sm:$0xff]  ;;  %v828_v21 = vld [vmem:[%s1079_s14 + $0x1] ss:$0 sm:$0xff]  ;;  %s663_s25 = sshll.u32 %s262_s22, 4 }
  0x2b   : > { %357 = vmatpush.bf16.msra.mxu1 %v730_v6  ;;  %v293_v9 = vld [vmem:[%s274_s4] sm:$0xf]  ;;  %391 = vmatpush.bf16.msra.mxu2 %v732_v7  ;;  %s264_s12 = scalar_lea.vmem [#allocation5], %s663_s25  ;;  %s736_s29 = sshll.u32 (%p1050_p12), %s931_s18, 3 }
  0x2c   : > { %425 = vmatpush.bf16.msra.mxu3 %v734_v8  ;;  %v829_v32 = vld [vmem:[%s1079_s14 + $0x2] ss:$0 sm:$0xff]  ;;  %v830_v33 = vld [vmem:[%s1079_s14 + $0x3] ss:$0 sm:$0xff]  ;;  %s485_s11 = sadd.s32 (%p1050_p12), %s927_s17, %s736_s29 }
  0x2d   : > { %674 = vmatmul.msk.bf16.vlgmr.msra.gmra.mxu0 %vm311_vm1, %v293_v9  ;;  %v294_v10 = vld [vmem:[#allocation2] sm:$0xff]  ;;  %s723_s10 = sshll.u32 (%p1050_p12), %s485_s11, 2 }
  0x2e   : > { %687 = vmatmul.msk.bf16.vlgmr.msra.gmra.mxu1 %vm311_vm1, %v293_v9  ;;  %700 = vmatmul.msk.bf16.vlgmr.msra.gmra.mxu2 %vm311_vm1, %v293_v9  ;;  %v332_v11 = vld [vmem:[#allocation2 + $0x8] sm:$0xff]  ;;  %s487_s26 = scalar_lea.vmem (%p1050_p12), %s1137_s3, %s723_s10 }
  0x2f   : > { %713 = vmatmul.msk.bf16.vlgmr.msra.gmra.mxu3 %vm311_vm1, %v293_v9  ;;  %v366_v16 = vld [vmem:[#allocation2 + $0x10] sm:$0xff] }
  0x30   : > { %v400_v17 = vld [vmem:[#allocation2 + $0x18] sm:$0xff] }
  0xaa   : > { %v324_v12 = vpop.f32.mrf.mxu0 }
  0xab   : > { %v359_v13 = vpop.f32.mrf.mxu1  ;;  %v328_v14 = vadd.f32 %v324_v12, %v294_v10 }
  0xac   : > { %v363_v15 = vadd.f32 %v359_v13, %v332_v11 }
  0xad   : > { %330 = vst.msk [vmem:[#allocation2] sm:$0xff] %vm288_vm0, %v328_v14 }
  0xae   : > { %364 = vst.msk [vmem:[#allocation2 + $0x8] sm:$0xff] %vm288_vm0, %v363_v15 }
  0xb1   : > { %v393_v19 = vpop.f32.mrf.mxu2 }
  0xb2   : > { %v427_v20 = vpop.f32.mrf.mxu3  ;;  %v397_v22 = vadd.f32 %v393_v19, %v366_v16  ;;  %v326_v24 = vpop.f32.mrf.mxu0 }
  0xb3   : > { %v431_v23 = vadd.f32 %v427_v20, %v400_v17  ;;  %v361_v25 = vpop.f32.mrf.mxu1 }
  0xb4   : > { %v436_v26 = vld [vmem:[#allocation2] sm:$0xff]  ;;  %398 = vst.msk [vmem:[#allocation2 + $0x10] sm:$0xff] %vm288_vm0, %v397_v22 }
  0xb5   : > { %v441_v27 = vadd.f32 %v827_v18, %v436_v26  ;;  %v445_v28 = vld [vmem:[#allocation2 + $0x8] sm:$0xff]  ;;  %432 = vst.msk [vmem:[#allocation2 + $0x18] sm:$0xff] %vm288_vm0, %v431_v23 }
  0xb6   : > { %v451_v29 = vadd.f32 %v828_v21, %v445_v28 }
  0xb7   : > { %v442_v30 = vpack.c.bf16 %v441_v27, %v441_v27 }
  0xb8   : > { %v452_v31 = vpack.c.bf16 %v451_v29, %v451_v29 }
  0xb9   : > { %444 = vst.msk [vmem:[%s264_s12] sm:$0xf] %vm443_vm2, %v442_v30  ;;  %v395_v34 = vpop.f32.mrf.mxu2 }
  0xba   : > { %v429_v35 = vpop.f32.mrf.mxu3  ;;  %715 = vst.msk [vmem:[%s264_s12 + $0x4] sm:$0xf] %vm443_vm2, %v452_v31 }
  0xbb   : > { %v455_v36 = vld [vmem:[#allocation2 + $0x10] sm:$0xff] }
  0xbc   : > { %v461_v37 = vadd.f32 %v829_v32, %v455_v36  ;;  %v465_v38 = vld [vmem:[#allocation2 + $0x18] sm:$0xff] }
  0xbd   : > { %v471_v39 = vadd.f32 %v830_v33, %v465_v38  ;;  %481 = sbr.rel (!%p1050_p12) target bundleno = 202 (0xca), region = 48 }
  0xbe   : > { %v462_v40 = vpack.c.bf16 %v461_v37, %v461_v37 }
  0xbf   : > { %v472_v41 = vpack.c.bf16 %v471_v39, %v471_v39 }
  0xc0   : > { %717 = vst.msk [vmem:[%s264_s12 + $0x8] sm:$0xf] %vm443_vm2, %v462_v40  ;;  %v504_v42 = vld [vmem:[%s264_s12] sm:$0xf] (%p1050_p12) }
  0xc1   : > { %719 = vst.msk [vmem:[%s264_s12 + $0xc] sm:$0xf] %vm443_vm2, %v472_v41  ;;  %v506_v43 = vld [vmem:[%s264_s12 + $0x4] sm:$0xf] (%p1050_p12) }
  0xc2   : > { %505 = vst [vmem:[%s487_s26] sm:$0xf] %v504_v42 }
  0xc3   : > { %507 = vst [vmem:[%s487_s26 + $0x8] sm:$0xf] %v506_v43 }
  0xc7   : > { %v508_v44 = vld [vmem:[%s264_s12 + $0x8] sm:$0xf] }
  0xc8   : > { %v510_v45 = vld [vmem:[%s264_s12 + $0xc] sm:$0xf]  ;;  %509 = vst [vmem:[%s487_s26 + $0x10] sm:$0xf] %v508_v44 }
  0xc9   : > { %511 = vst [vmem:[%s487_s26 + $0x18] sm:$0xf] %v510_v45 }
  0xca PF: > { %s16_s21 = sadd.s32 1, %s943_s21   ;;  %s1145_s7 = sld [smem:[#allocation7_spill]] }
  0xcb   : > { %p13_p6 = scmp.ge.s32.totalorder %s16_s21, 8   ;;  %s1146_s23 = sld [smem:[#allocation8_spill]] }
  0xcc   : > { %s1147_s12 = smov %s911_s13  ;;  %s1148_s13 = smov %s1048_s6 }
  0xcd   : > { %s1149_s14 = smov %s919_s15  ;;  %s1150_s15 = smov %s923_s16 }
  0xce   : > { %s1151_s16 = smov %s1045_s5  ;;  %s1152_s17 = smov %s935_s19 }
  0xcf   : > { %s1153_s18 = smov %s939_s20  ;;  %15 = sbr.rel (!%p13_p6) target bundleno = 6 (0x6), region = 139 }
  0xd0   : > { %s1154_s19 = smov %s1145_s7 }
  0xd1   : > { %s1155_s20 = smov %s1146_s23 }
  0xd4   :  { %553 = vsyncpa [#allocation4], 1 }
  0xd5   :  { %555 = vsyncpa [#allocation4 + $0x1], 1 }

// kernel: deberta_multitask_forward.16
= control target key start
LH: loop header
LB: loop body
LE: loop exit
PB: predicated region body
PF: predicated region fallthrough
CT: control target
= control target key end

     0   :  { %vm19_vm0 = vcmask 523264   ;;  %v130_v1 = vmov 0.0   ;;  %vm47_vm1 = vcmask 261120   ;;  %vm101_vm2 = vcmask 519168   ;;  %s173_s1 = inlined_call_operand.vmem [shape: bf16[32,64], index: 1, kind: input, shape index: {}]   ;;  %s174_s2 = inlined_call_operand.vmem [shape: f32[1,64], index: 2, kind: input, shape index: {}]   ;;  %s175_s0 = inlined_call_operand.vmem [shape: bf16[16,32], index: 0, kind: input, shape index: {}]   ;;  %s176_s3 = inlined_call_operand.vmem [shape: bf16[16,64], index: 3, kind: output, shape index: {}]  }
   0x1   :  { %v123_v0 = vld [vmem:[%s173_s1 + $0x8] sm:$0xff]  ;;  %20 = vst.msk [vmem:[#allocation2] sm:$0xff] %vm19_vm0, %v130_v1  ;;  %v122_v2 = vld [vmem:[%s173_s1] sm:$0xff] }
   0x2   :  { %21 = vst.msk [vmem:[#allocation2 + $0x8] sm:$0xff] %vm19_vm0, %v130_v1  ;;  %57 = vmatpush.bf16.msra.mxu0 %v123_v0  ;;  %v121_v3 = vld [vmem:[%s175_s0] sm:$0xff] }
   0x3   :  { %v125_v8 = vld [vmem:[%s174_s2] ss:$0 sm:$0xff] }
   0x6   :  { %58 = vmatpush.bf16.msra.mxu0 %v122_v2 }
   0x8   :  { %v22_v4 = vld [vmem:[#allocation2] sm:$0xff] }
   0x9   :  { %120 = vmatmul.msk.bf16.vlgmr.msra.gmra.mxu0 %vm47_vm1, %v121_v3  ;;  %v23_v7 = vld [vmem:[#allocation2 + $0x8] sm:$0xff] }
  0x86   :  { %v60_v5 = vpop.f32.mrf.mxu0 }
  0x87   :  { %v65_v6 = vadd.f32 %v60_v5, %v22_v4 }
  0x89   :  { %68 = vst.msk [vmem:[#allocation2] sm:$0xff] %vm19_vm0, %v65_v6 }
  0x8e   :  { %v62_v9 = vpop.f32.mrf.mxu0 }
  0x8f   :  { %v66_v10 = vadd.f32 %v62_v9, %v23_v7 }
  0x90   :  { %v73_v11 = vld [vmem:[#allocation2] sm:$0xff] }
  0x91   :  { %v79_v12 = vadd.f32 %v125_v8, %v73_v11  ;;  %69 = vst.msk [vmem:[#allocation2 + $0x8] sm:$0xff] %vm19_vm0, %v66_v10 }
  0x93   :  { %v81_v13 = vmul.f32 %v79_v12, %v79_v12 }
  0x95   :  { %v83_v14 = vmul.f32 %v81_v13, %v79_v12 }
  0x97   :  { %v85_v15 = vmul.f32 0.044715, %v83_v14 }
  0x98   :  { %v74_v16 = vld [vmem:[#allocation2 + $0x8] sm:$0xff] }
  0x99   :  { %v87_v17 = vadd.f32 %v85_v15, %v79_v12  ;;  %v80_v18 = vadd.f32 %v125_v8, %v74_v16 }
  0x9b   :  { %v89_v19 = vmul.f32 0.7978846, %v87_v17  ;;  %v82_v20 = vmul.f32 %v80_v18, %v80_v18 }
  0x9d   :  { %126 = vtanh.f32 %v89_v19  ;;  %v84_v21 = vmul.f32 %v82_v20, %v80_v18 }
  0x9f   :  { %v86_v22 = vmul.f32 0.044715, %v84_v21 }
  0xa1   :  { %v88_v23 = vadd.f32 %v86_v22, %v80_v18 }
  0xa3   :  { %v127_v24 = vpop.eup %126  ;;  %v90_v25 = vmul.f32 0.7978846, %v88_v23 }
  0xa4   :  { %v93_v26 = vadd.f32 1.0, %v127_v24 }
  0xa5   :  { %128 = vtanh.f32 %v90_v25 }
  0xa6   :  { %v95_v27 = vmul.f32 0.5, %v93_v26 }
  0xa8   :  { %v97_v28 = vmul.f32 %v95_v27, %v79_v12 }
  0xaa   :  { %v99_v29 = vpack.c.bf16 %v97_v28, %v97_v28 }
  0xab   :  { %v129_v30 = vpop.eup %128 }
  0xac   :  { %102 = vst.msk [vmem:[%s176_s3] sm:$0xf] %vm101_vm2, %v99_v29  ;;  %v94_v31 = vadd.f32 1.0, %v129_v30 }
  0xae   :  { %v96_v32 = vmul.f32 0.5, %v94_v31 }
  0xb0   :  { %v98_v33 = vmul.f32 %v96_v32, %v80_v18 }
  0xb2   :  { %v100_v34 = vpack.c.bf16 %v98_v33, %v98_v33 }
  0xb4   :  { %103 = vst.msk [vmem:[%s176_s3 + $0x4] sm:$0xf] %vm101_vm2, %v100_v34 }

// kernel: deberta_multitask_forward.17
= control target key start
LH: loop header
LB: loop body
LE: loop exit
PB: predicated region body
PF: predicated region fallthrough
CT: control target
= control target key end

     0   :  { %vm28_vm0 = vcmask 261120   ;;  %v225_v1 = vmov 0.0   ;;  %vm72_vm1 = vcmask 523264   ;;  %v226_v24 = vmov 32.0   ;;  %s303_s1 = inlined_call_operand.vmem [shape: bf16[64,32], index: 1, kind: input, shape index: {}]   ;;  %s304_s0 = inlined_call_operand.vmem [shape: bf16[16,64], index: 0, kind: input, shape index: {}]   ;;  %s305_s2 = inlined_call_operand.vmem [shape: f32[1,32], index: 2, kind: input, shape index: {}, may-alias: {2,5}]   ;;  %s306_s3 = inlined_call_operand.vmem [shape: bf16[16,32], index: 3, kind: input, shape index: {}]   ;;  %s307_s4 = inlined_call_operand.vmem [shape: f32[1,32], index: 4, kind: input, shape index: {}]   ;;  %s308_s5 = inlined_call_operand.vmem [shape: f32[1,32], index: 5, kind: input, shape index: {}, may-alias: {2,5}]   ;;  %s309_s6 = inlined_call_operand.vmem [shape: bf16[16,32], index: 6, kind: output, shape index: {}]  }
   0x1   :  { %v209_v0 = vld [vmem:[%s303_s1 + $0x18] sm:$0xff]  ;;  %29 = vst.msk [vmem:[#allocation2] sm:$0xff] %vm28_vm0, %v225_v1  ;;  %v208_v2 = vld [vmem:[%s303_s1 + $0x10] sm:$0xff]  ;;  %v207_v3 = vld [vmem:[%s303_s1 + $0x8] sm:$0xff]  ;;  %219 = vrcp.f32 %v226_v24  ;;  %vm177_vm7 = vcmask 257024  }
   0x2   :  { %30 = vst.msk [vmem:[#allocation2 + $0x8] sm:$0xff] %vm28_vm0, %v225_v1  ;;  %80 = vmatpush.bf16.msra.mxu0 %v209_v0  ;;  %v206_v4 = vld [vmem:[%s303_s1] sm:$0xff] }
   0x3   :  { %v205_v5 = vld [vmem:[%s304_s0] sm:$0xff] }
   0x4   :  { %v211_v10 = vld [vmem:[%s306_s3] sm:$0xff]  }
   0x5   :  { %v216_v11 = vld [vmem:[%s305_s2] ss:$0 sm:$0xff]  ;;  %v212_v14 = vunpack.c.l.bf16 %v211_v10  ;;  %v213_v19 = vunpack.c.h.bf16 %v211_v10 }
   0x6   :  { %81 = vmatpush.bf16.msra.mxu0 %v208_v2  ;;  %v217_v55 = vld [vmem:[%s307_s4] ss:$0 sm:$0xff] }
   0x7   :  { %v220_v25 = vpop.eup %219  ;;  %v218_v58 = vld [vmem:[%s308_s5] ss:$0 sm:$0xff] }
   0x8   :  { %v31_v6 = vld [vmem:[#allocation2] sm:$0xff]  ;;  %v119_v26 = vmul.f32 32.0, %v220_v25  ;;  %vm123_vm2 = vweird.f32 %v220_v25 }
   0x9   :  { %v32_v9 = vld [vmem:[#allocation2 + $0x8] sm:$0xff] }
   0xa   :  { %82 = vmatpush.bf16.msra.mxu0 %v207_v3  ;;  %v120_v27 = vsub.f32 1.0, %v119_v26 }
   0xc   :  { %v121_v28 = vmul.f32 %v220_v25, %v120_v27 }
   0xe   :  { %83 = vmatpush.bf16.msra.mxu0 %v206_v4  ;;  %v122_v29 = vadd.f32 %v220_v25, %v121_v28 }
  0x10   :  { %v124_v30 = vsel %vm123_vm2, %v220_v25, %v122_v29 }
  0x11   :  { %204 = vmatmul.msk.bf16.vlgmr.msra.gmra.mxu0 %vm72_vm1, %v205_v5 }
  0x8e   :  { %v85_v7 = vpop.f32.mrf.mxu0 }
  0x8f   :  { %v90_v8 = vadd.f32 %v85_v7, %v31_v6 }
  0x91   :  { %93 = vst.msk [vmem:[#allocation2] sm:$0xff] %vm28_vm0, %v90_v8 }
  0x96   :  { %v87_v12 = vpop.f32.mrf.mxu0 }
  0x97   :  { %v91_v13 = vadd.f32 %v87_v12, %v32_v9 }
  0x98   :  { %v98_v15 = vld [vmem:[#allocation2] sm:$0xff] }
  0x99   :  { %94 = vst.msk [vmem:[#allocation2 + $0x8] sm:$0xff] %vm28_vm0, %v91_v13  ;;  %v104_v16 = vadd.f32 %v216_v11, %v98_v15 }
  0x9b   :  { %v110_v17 = vadd.f32 %v212_v14, %v104_v16 }
  0x9d   :  { %v112_v18 = vsel %vm28_vm0, %v110_v17, 0.0 }
  0x9e   :  { %113 = vadd.xlane.f32.xlu0 %v112_v18 }
  0xa0   :  { %v99_v20 = vld [vmem:[#allocation2 + $0x8] sm:$0xff] }
  0xa1   :  { %v105_v21 = vadd.f32 %v216_v11, %v99_v20 }
  0xa3   :  { %v111_v22 = vadd.f32 %v213_v19, %v105_v21 }
  0xa5   :  { %v115_v23 = vsel %vm28_vm0, %v111_v22, 0.0 }
  0xa6   :  { %116 = vadd.xlane.f32.xlu0 %v115_v23 }
 0x111   :  { %v114_v31 = vpop.xlane.xlu0 %113 }
 0x112   :  { %v125_v32 = vmul.f32 %v124_v30, %v114_v31 }
 0x114   :  { %v127_v33 = vsub.f32 %v110_v17, %v125_v32 }
 0x116   :  { %v129_v34 = vmul.f32 %v127_v33, %v127_v33 }
 0x118   :  { %v131_v35 = vsel %vm28_vm0, %v129_v34, 0.0 }
 0x119   :  { %132 = vadd.xlane.f32.xlu1 %v131_v35  ;;  %v117_v36 = vpop.xlane.xlu0 %116 }
 0x11a   :  { %v126_v37 = vmul.f32 %v124_v30, %v117_v36 }
 0x11c   :  { %v128_v38 = vsub.f32 %v111_v22, %v126_v37 }
 0x11e   :  { %v130_v39 = vmul.f32 %v128_v38, %v128_v38 }
 0x120   :  { %v134_v40 = vsel %vm28_vm0, %v130_v39, 0.0 }
 0x121   :  { %135 = vadd.xlane.f32.xlu1 %v134_v40 }
 0x18c   :  { %v133_v41 = vpop.xlane.xlu1 %132 }
 0x18d   :  { %v137_v42 = vmul.f32 %v133_v41, %v124_v30 }
 0x18f   :  { %v139_v43 = vadd.f32 1e-07, %v137_v42 }
 0x191   :  { %221 = vrsqrt.f32 %v139_v43  ;;  %vm147_vm4 = vweird.f32 %v139_v43 }
 0x194   :  { %v136_v44 = vpop.xlane.xlu1 %135 }
 0x195   :  { %v138_v45 = vmul.f32 %v136_v44, %v124_v30 }
 0x197   :  { %v222_v46 = vpop.eup %221  ;;  %v140_v47 = vadd.f32 1e-07, %v138_v45 }
 0x198   :  { %v142_v48 = vmul.f32 %v222_v46, %v139_v43  ;;  %vm148_vm3 = vweird.f32 %v222_v46 }
 0x199   :  { %223 = vrsqrt.f32 %v140_v47  ;;  %vm149_vm5 = vmor %vm147_vm4, %vm148_vm3  ;;  %vm157_vm8 = vweird.f32 %v140_v47 }
 0x19a   :  { %v143_v49 = vmul.f32 %v222_v46, %v142_v48 }
 0x19c   :  { %v144_v50 = vmul.f32 0.5, %v143_v49 }
 0x19e   :  { %v145_v51 = vsub.f32 1.5, %v144_v50 }
 0x19f   :  { %v224_v52 = vpop.eup %223 }
 0x1a0   :  { %v146_v53 = vmul.f32 %v222_v46, %v145_v51  ;;  %v152_v54 = vmul.f32 %v224_v52, %v140_v47  ;;  %vm158_vm6 = vweird.f32 %v224_v52 }
 0x1a1   :  { %vm159_vm9 = vmor %vm157_vm8, %vm158_vm6 }
 0x1a2   :  { %v150_v56 = vsel %vm149_vm5, %v222_v46, %v146_v53  ;;  %v153_v57 = vmul.f32 %v224_v52, %v152_v54 }
 0x1a3   :  { %v161_v59 = vmul.f32 %v150_v56, %v127_v33 }
 0x1a4   :  { %v154_v60 = vmul.f32 0.5, %v153_v57 }
 0x1a5   :  { %v167_v61 = vmul.f32 %v217_v55, %v161_v59 }
 0x1a6   :  { %v155_v62 = vsub.f32 1.5, %v154_v60 }
 0x1a7   :  { %v173_v63 = vadd.f32 %v218_v58, %v167_v61 }
 0x1a8   :  { %v156_v0 = vmul.f32 %v224_v52, %v155_v62 }
 0x1a9   :  { %v175_v1 = vpack.c.bf16 %v173_v63, %v173_v63 }
 0x1aa   :  { %v160_v2 = vsel %vm159_vm9, %v224_v52, %v156_v0 }
 0x1ab   :  { %178 = vst.msk [vmem:[%s309_s6] sm:$0xf] %vm177_vm7, %v175_v1  ;;  %v162_v3 = vmul.f32 %v160_v2, %v128_v38 }
 0x1ad   :  { %v168_v4 = vmul.f32 %v217_v55, %v162_v3 }
 0x1af   :  { %v174_v5 = vadd.f32 %v218_v58, %v168_v4 }
 0x1b1   :  { %v176_v6 = vpack.c.bf16 %v174_v5, %v174_v5 }
 0x1b3   :  { %179 = vst.msk [vmem:[%s309_s6 + $0x4] sm:$0xf] %vm177_vm7, %v176_v6 }

// kernel: deberta_multitask_forward.23
= control target key start
LH: loop header
LB: loop body
LE: loop exit
PB: predicated region body
PF: predicated region fallthrough
CT: control target
= control target key end

     0   :  { %vm36_vm0 = vcmask 261120   ;;  %s105_s1 = inlined_call_operand.vmem [shape: bf16[32,128], index: 1, kind: input, shape index: {}]   ;;  %s106_s2 = inlined_call_operand.vmem [shape: f32[1,128], index: 2, kind: input, shape index: {}]   ;;  %s107_s0 = inlined_call_operand.vmem [shape: bf16[2,32], index: 0, kind: input, shape index: {}]   ;;  %s108_s3 = inlined_call_operand.vmem [shape: f32[2,128], index: 3, kind: output, shape index: {}]  }
   0x1   :  { %v68_v0 = vld [vmem:[%s105_s1 + $0x8] sm:$0xff]  ;;  %v67_v1 = vld [vmem:[%s105_s1] sm:$0xff] }
   0x2   :  { %46 = vmatpush.bf16.msra.mxu0 %v68_v0  ;;  %v15_v2 = vld [vmem:[%s107_s0] sm:$0x1] }
   0x3   :  { %v69_v3 = vld [vmem:[%s106_s2] ss:$0 sm:$0xff] }
   0x6   :  { %47 = vmatpush.bf16.msra.mxu0 %v67_v1 }
   0x9   :  { %66 = vmatmul.msk.bf16.vlgmr.msra.gmra.mxu0 %vm36_vm0, %v15_v2 }
  0x86   :  { %v49_v4 = vpop.f32.mrf.mxu0 }
  0x87   :  { %v50_v5 = vadd.f32 %v69_v3, %v49_v4 }
  0x89   :  { %53 = vst [vmem:[%s108_s3] sm:$0x3] %v50_v5 }
  0x8e   :  { %v51_v6 = vpop.f32.mrf.mxu0 }

</bundles_post_ra>
